<compile_context>
chip_gen: v7x
topology: tpu7x:2x2x1
jax: 0.10.0
libtpu: 0.0.40
codegen_flags: <defaults>
</compile_context>

<pallas_src>
import functools

import jax
import jax.numpy as jnp
from jax.experimental import pallas as pl
from jax.experimental.pallas import tpu as pltpu


def _make_resblock_kernel(stride, Ho, Wo, has_proj, row_tile):
    """Builds the fused residual-block kernel for static (stride, Ho, Wo, has_proj, row_tile)."""
    s = stride
    Hq = Ho + (2 // s)                 # rows per parity part: (Ho - 1) + max_kh // s + 1
    taps = [(kh, kw) for kh in range(3) for kw in range(3)]

    # Static row tiles of the output (<= row_tile rows each, remainder handled).
    tiles = []
    r = 0
    while r < Ho:
        rb = min(row_tile, Ho - r)
        tiles.append((r, rb))
        r += rb

    def kernel(*refs):
        if has_proj:
            (xq_ref, w1_ref, b1_ref, w2_ref, b2_ref,
             wsc_ref, bsc_ref, out_ref, xf_ref, y1p_ref) = refs
        else:
            (xq_ref, w1_ref, b1_ref, w2_ref, b2_ref,
             out_ref, xf_ref, y1p_ref) = refs

        _, rows_total, Wq, Cin = xq_ref.shape
        Cout = w1_ref.shape[-1]
        f32 = jnp.float32
        bf16 = jnp.bfloat16

        # ---- stage the bf16 input block to f32 (aligned, full-width chunk copies) -----------
        copy_rows = max(1, min(rows_total, 16384 // max(1, Wq * Cin)))
        rr = 0
        while rr < rows_total:
            rc = min(copy_rows, rows_total - rr)
            xf_ref[rr:rr + rc, :, :] = xq_ref[0, rr:rr + rc, :, :].astype(f32)
            rr += rc

        def conv1_tap(kh, kw, r0, rb):
            # Tap (kh, kw) of the (stride-s, pad-1) conv input for output rows [r0, r0+rb),
            # as a unit-stride static slice of the parity-decomposed padded input.
            p = (kh % s) * s + (kw % s)
            rs = p * Hq + kh // s + r0
            cs = kw // s
            return xf_ref[rs:rs + rb, cs:cs + Wo, :].reshape(rb * Wo, Cin)

        # ---- zero only the 1-wide border of the conv2 padding scratch (4 thin strips) -------
        Hp, Wp = Ho + 2, Wo + 2
        y1p_ref[0:1, :, :] = jnp.zeros((1, Wp, Cout), f32)
        y1p_ref[Hp - 1:Hp, :, :] = jnp.zeros((1, Wp, Cout), f32)
        y1p_ref[:, 0:1, :] = jnp.zeros((Hp, 1, Cout), f32)
        y1p_ref[:, Wp - 1:Wp, :] = jnp.zeros((Hp, 1, Cout), f32)

        # ---- phase 1: conv1 (3x3, stride s) + bias + ReLU -> scratch interior, row-tiled ----
        for (r0, rb) in tiles:
            acc = None
            for (kh, kw) in taps:
                d = jnp.dot(conv1_tap(kh, kw, r0, rb).astype(bf16),
                            w1_ref[kh * 3 + kw], preferred_element_type=f32)
                acc = d if acc is None else acc + d
            y1 = jnp.maximum(acc + b1_ref[...], 0.0)                       # (rb*Wo, Cout) f32
            y1p_ref[1 + r0:1 + r0 + rb, 1:Wo + 1, :] = y1.reshape(rb, Wo, Cout)

        # ---- phase 2: conv2 (3x3, stride 1) + bias + shortcut + ReLU, row-tiled --------------
        for (r0, rb) in tiles:
            acc = None
            for (kh, kw) in taps:
                tap = y1p_ref[kh + r0:kh + r0 + rb, kw:kw + Wo, :].reshape(rb * Wo, Cout)
                d = jnp.dot(tap.astype(bf16), w2_ref[kh * 3 + kw],
                            preferred_element_type=f32)
                acc = d if acc is None else acc + d
            y2 = acc + b2_ref[...]

            # Center tap (kh=kw=1) of conv1's input is exactly x (s=1) or x[::s, ::s] (s>1),
            # i.e. precisely what path2 consumes - no extra DMA needed.
            sc = conv1_tap(1, 1, r0, rb)                                   # (rb*Wo, Cin) f32
            if has_proj:
                short = jnp.dot(sc.astype(bf16), wsc_ref[...],
                                preferred_element_type=f32) + bsc_ref[...]
            else:
                short = sc                                                 # identity (Cin == Cout)

            out_ref[0, r0 * Wo:(r0 + rb) * Wo, :] = jnp.maximum(y2 + short, 0.0)

    return kernel


def _parity_decompose(x_pad, s, Hq, Wq):
    """(N, H+2, W+2, C) -> (N, s*s*Hq, Wq, C); part (ph, pw) = x_pad[:, ph::s, pw::s]."""
    parts = []
    for ph in range(s):
        for pw in range(s):
            p = x_pad[:, ph::s, pw::s, :][:, :Hq, :Wq, :]
            pad_h = Hq - p.shape[1]
            pad_w = Wq - p.shape[2]
            if pad_h or pad_w:
                p = jnp.pad(p, ((0, 0), (0, pad_h), (0, pad_w), (0, 0)))
            parts.append(p)
    return parts[0] if len(parts) == 1 else jnp.concatenate(parts, axis=1)


@functools.partial(jax.jit, static_argnames=("stride",))
def residual_block_forward(x, params, stride=1):
    """x: (N, Cin, H, W) float32 (NCHW, like PyTorch). Returns (N, Cout, Ho, Wo) float32."""
    N, Cin, H, W = x.shape
    Cout = params["w1"].shape[0]
    s = int(stride)
    Ho = (H - 1) // s + 1
    Wo = (W - 1) // s + 1
    Hq = Ho + (2 // s)
    Wq = Wo + (2 // s)
    P = s * s
    M = Ho * Wo

    has_proj = "wsc" in params
    if s != 1 and not has_proj:
        raise ValueError("stride != 1 requires the projection shortcut params 'wsc'/'bsc'.")
    if not has_proj and Cin != Cout:
        raise ValueError("identity shortcut requires in_channels == out_channels.")

    # NCHW -> NHWC, cast to bf16 (halves all downstream HBM passes + the kernel's input DMA),
    # pad spatially by 1 (padding=1 of the 3x3 convs), parity-decompose for the stride.
    x_nhwc = jnp.transpose(x, (0, 2, 3, 1)).astype(jnp.bfloat16)
    x_pad = jnp.pad(x_nhwc, ((0, 0), (1, 1), (1, 1), (0, 0)))
    xq = _parity_decompose(x_pad, s, Hq, Wq)                  # (N, P*Hq, Wq, Cin) bf16

    # PyTorch weight layout (Cout, Cin, KH, KW) -> per-tap (9, Cin, Cout); bf16 for the MXU.
    w1k = jnp.transpose(params["w1"], (2, 3, 1, 0)).reshape(9, Cin, Cout).astype(jnp.bfloat16)
    w2k = jnp.transpose(params["w2"], (2, 3, 1, 0)).reshape(9, Cout, Cout).astype(jnp.bfloat16)
    b1 = params["b1"].reshape(1, Cout).astype(jnp.float32)
    b2 = params["b2"].reshape(1, Cout).astype(jnp.float32)

    args = [xq, w1k, b1, w2k, b2]
    in_specs = [
        pl.BlockSpec((1, P * Hq, Wq, Cin), lambda n: (n, 0, 0, 0)),   # per-image input block
        pl.BlockSpec((9, Cin, Cout), lambda n: (0, 0, 0)),            # weights: VMEM-resident
        pl.BlockSpec((1, Cout), lambda n: (0, 0)),
        pl.BlockSpec((9, Cout, Cout), lambda n: (0, 0, 0)),
        pl.BlockSpec((1, Cout), lambda n: (0, 0)),
    ]
    if has_proj:
        wsc = params["wsc"][:, :, 0, 0].T.astype(jnp.bfloat16)        # (Cin, Cout)
        bsc = params["bsc"].reshape(1, Cout).astype(jnp.float32)
        args += [wsc, bsc]
        in_specs += [pl.BlockSpec((Cin, Cout), lambda n: (0, 0)),
                     pl.BlockSpec((1, Cout), lambda n: (0, 0))]

    # Row tile: keep each tap matmul's (rows*Wo, Cout) f32 accumulator vreg-resident.
    row_tile = max(1, min(Ho, 512 // max(1, Wo)))

    # VMEM budget (double-buffered bf16 input + f32 output blocks, weights, scratches).
    in_bytes = P * Hq * Wq * Cin * 2
    out_bytes = M * Cout * 4
    w_bytes = (9 * Cin * Cout + 9 * Cout * Cout + (Cin * Cout if has_proj else 0)) * 2
    scratch_bytes = P * Hq * Wq * Cin * 4 + (Ho + 2) * (Wo + 2) * Cout * 4
    est = 2 * in_bytes + 2 * out_bytes + 2 * w_bytes + scratch_bytes
    vmem_limit = int(min(max(4 * est, 16 * 2 ** 20), 48 * 2 ** 20))

    flops_per_img = 2 * M * Cout * (9 * Cin + 9 * Cout + (Cin if has_proj else 0))
    cost = pl.CostEstimate(flops=N * flops_per_img,
                           transcendentals=0,
                           bytes_accessed=N * (in_bytes + out_bytes) + w_bytes)

    out = pl.pallas_call(
        _make_resblock_kernel(s, Ho, Wo, has_proj, row_tile),
        grid=(N,),
        in_specs=in_specs,
        out_specs=pl.BlockSpec((1, M, Cout), lambda n: (n, 0, 0)),
        out_shape=jax.ShapeDtypeStruct((N, M, Cout), jnp.float32),
        scratch_shapes=[
            pltpu.VMEM((P * Hq, Wq, Cin), jnp.float32),        # f32 staging of the bf16 input
            pltpu.VMEM((Ho + 2, Wo + 2, Cout), jnp.float32),   # conv1 output with zero border
        ],
        compiler_params=pltpu.CompilerParams(
            dimension_semantics=("parallel",),
            vmem_limit_bytes=vmem_limit),
        cost_estimate=cost,
    )(*args)

    out_nhwc = out.reshape(N, Ho, Wo, Cout)
    return jnp.transpose(out_nhwc, (0, 3, 1, 2))              # back to NCHW
    # TODO(synk): bf16 y1 scratch + a row-tile grid axis (v7x N=1) skipped: both need
    # unaligned packed-dtype stores / halo re-DMA whose Mosaic lowering isn't guaranteed here.


# ---------------------------- pure-JAX reference (for sanity check) ----------------------------
def _ref_conv(x, w, b, stride, padding):
    out = jax.lax.conv_general_dilated(
        x, w, window_strides=(stride, stride),
        padding=[(padding, padding), (padding, padding)],
        dimension_numbers=("NCHW", "OIHW", "NCHW"))
    return out + b.reshape(1, -1, 1, 1)


def reference_block(x, params, stride):
    fx = jnp.maximum(_ref_conv(x, params["w1"], params["b1"], stride, 1), 0.0)
    fx = _ref_conv(fx, params["w2"], params["b2"], 1, 1)
    sc = _ref_conv(x, params["wsc"], params["bsc"], stride, 0) if stride != 1 else x
    return jnp.maximum(fx + sc, 0.0)


if __name__ == "__main__":
    key = jax.random.PRNGKey(0)
    N, Cin, H, W = 2, 4, 16, 16
    x = jax.random.normal(key, (N, Cin, H, W), jnp.float32)

    # ---- case 1: stride=1, path2 = Identity (requires Cin == Cout) ----
    Cout1 = 4
    ks = jax.random.split(jax.random.PRNGKey(1), 4)
    params1 = {
        "w1": 0.1 * jax.random.normal(ks[0], (Cout1, Cin, 3, 3), jnp.float32),
        "b1": 0.1 * jax.random.normal(ks[1], (Cout1,), jnp.float32),
        "w2": 0.1 * jax.random.normal(ks[2], (Cout1, Cout1, 3, 3), jnp.float32),
        "b2": 0.1 * jax.random.normal(ks[3], (Cout1,), jnp.float32),
    }
    out1 = residual_block_forward(x, params1, stride=1)
    jax.block_until_ready(out1)

    # ---- case 2: stride=2, path2 = 1x1 conv with stride 2 ----
    Cout2 = 8
    ks = jax.random.split(jax.random.PRNGKey(2), 6)
    params2 = {
        "w1": 0.1 * jax.random.normal(ks[0], (Cout2, Cin, 3, 3), jnp.float32),
        "b1": 0.1 * jax.random.normal(ks[1], (Cout2,), jnp.float32),
        "w2": 0.1 * jax.random.normal(ks[2], (Cout2, Cout2, 3, 3), jnp.float32),
        "b2": 0.1 * jax.random.normal(ks[3], (Cout2,), jnp.float32),
        "wsc": 0.1 * jax.random.normal(ks[4], (Cout2, Cin, 1, 1), jnp.float32),
        "bsc": 0.1 * jax.random.normal(ks[5], (Cout2,), jnp.float32),
    }
    out2 = residual_block_forward(x, params2, stride=2)
    jax.block_until_ready(out2)

    # sanity check against the f32 XLA convolution reference (bf16 MXU inputs, f32 accumulation)
    ref1 = reference_block(x, params1, 1)
    ref2 = reference_block(x, params2, 2)
    assert out1.shape == (N, Cout1, H, W)
    assert out2.shape == (N, Cout2, H // 2, W // 2)
    assert jnp.max(jnp.abs(out1 - ref1)) < 5e-2
    assert jnp.max(jnp.abs(out2 - ref2)) < 5e-2

    print("KERNEL_OK")
</pallas_src>

<mosaic_0001>
module attributes {stable_mosaic.version = 11 : i64} {
  func.func @kernel(%arg0: i32, %arg1: memref<1x18x18x4xbf16, #tpu.memory_space<vmem>>, %arg2: memref<9x4x4xbf16, #tpu.memory_space<vmem>>, %arg3: memref<1x4xf32, #tpu.memory_space<vmem>>, %arg4: memref<9x4x4xbf16, #tpu.memory_space<vmem>>, %arg5: memref<1x4xf32, #tpu.memory_space<vmem>>, %arg6: memref<1x256x4xf32, #tpu.memory_space<vmem>>, %arg7: memref<18x18x4xf32, #tpu.memory_space<vmem>>, %arg8: memref<18x18x4xf32, #tpu.memory_space<vmem>>) attributes {dimension_semantics = [#tpu.dimension_semantics<parallel>], iteration_bounds = array<i64: 2>, scalar_prefetch = 0 : i64, scratch_operands = 2 : i64, tpu.core_type = #tpu.core_type<tc>, window_params = [{transform_indices = @transform_0, window_bounds = array<i64: 1, 18, 18, 4>}, {pipeline_mode = #tpu.pipeline_mode<synchronous>, transform_indices = @transform_1, window_bounds = array<i64: 9, 4, 4>}, {pipeline_mode = #tpu.pipeline_mode<synchronous>, transform_indices = @transform_2, window_bounds = array<i64: 1, 4>}, {pipeline_mode = #tpu.pipeline_mode<synchronous>, transform_indices = @transform_3, window_bounds = array<i64: 9, 4, 4>}, {pipeline_mode = #tpu.pipeline_mode<synchronous>, transform_indices = @transform_4, window_bounds = array<i64: 1, 4>}, {transform_indices = @transform_5, window_bounds = array<i64: 1, 256, 4>}]} {
    %c0 = arith.constant 0 : index
    %c0_0 = arith.constant 0 : index
    %c0_1 = arith.constant 0 : index
    %c0_2 = arith.constant 0 : index
    %0 = vector.load %arg1[%c0, %c0_0, %c0_1, %c0_2] : memref<1x18x18x4xbf16, #tpu.memory_space<vmem>>, vector<1x18x18x4xbf16>
    %1 = vector.shape_cast %0 : vector<1x18x18x4xbf16> to vector<18x18x4xbf16>
    %2 = arith.extf %1 : vector<18x18x4xbf16> to vector<18x18x4xf32>
    %c0_3 = arith.constant 0 : index
    %c0_4 = arith.constant 0 : index
    %c0_5 = arith.constant 0 : index
    %3 = vector.load %arg7[%c0_3, %c0_4, %c0_5] : memref<18x18x4xf32, #tpu.memory_space<vmem>>, vector<18x18x4xf32>
    tpu.vector_store %arg7[%c0_3, %c0_4, %c0_5], %2 {strides = array<i32>} : memref<18x18x4xf32, #tpu.memory_space<vmem>>, vector<18x18x4xf32>,
    %cst = arith.constant 0.000000e+00 : f32
    %4 = vector.broadcast %cst : f32 to vector<1x18x4xf32>
    %c0_6 = arith.constant 0 : index
    %c0_7 = arith.constant 0 : index
    %c0_8 = arith.constant 0 : index
    %5 = vector.load %arg8[%c0_6, %c0_7, %c0_8] : memref<18x18x4xf32, #tpu.memory_space<vmem>>, vector<1x18x4xf32>
    tpu.vector_store %arg8[%c0_6, %c0_7, %c0_8], %4 {strides = array<i32>} : memref<18x18x4xf32, #tpu.memory_space<vmem>>, vector<1x18x4xf32>,
    %cst_9 = arith.constant 0.000000e+00 : f32
    %6 = vector.broadcast %cst_9 : f32 to vector<1x18x4xf32>
    %c17 = arith.constant 17 : index
    %c0_10 = arith.constant 0 : index
    %c0_11 = arith.constant 0 : index
    %7 = vector.load %arg8[%c17, %c0_10, %c0_11] : memref<18x18x4xf32, #tpu.memory_space<vmem>>, vector<1x18x4xf32>
    tpu.vector_store %arg8[%c17, %c0_10, %c0_11], %6 {strides = array<i32>} : memref<18x18x4xf32, #tpu.memory_space<vmem>>, vector<1x18x4xf32>,
    %cst_12 = arith.constant 0.000000e+00 : f32
    %8 = vector.broadcast %cst_12 : f32 to vector<18x1x4xf32>
    %c0_13 = arith.constant 0 : index
    %c0_14 = arith.constant 0 : index
    %c0_15 = arith.constant 0 : index
    %9 = vector.load %arg8[%c0_13, %c0_14, %c0_15] : memref<18x18x4xf32, #tpu.memory_space<vmem>>, vector<18x1x4xf32>
    tpu.vector_store %arg8[%c0_13, %c0_14, %c0_15], %8 {strides = array<i32>} : memref<18x18x4xf32, #tpu.memory_space<vmem>>, vector<18x1x4xf32>,
    %cst_16 = arith.constant 0.000000e+00 : f32
    %10 = vector.broadcast %cst_16 : f32 to vector<18x1x4xf32>
    %c0_17 = arith.constant 0 : index
    %c17_18 = arith.constant 17 : index
    %c0_19 = arith.constant 0 : index
    %11 = vector.load %arg8[%c0_17, %c17_18, %c0_19] : memref<18x18x4xf32, #tpu.memory_space<vmem>>, vector<18x1x4xf32>
    tpu.vector_store %arg8[%c0_17, %c17_18, %c0_19], %10 {strides = array<i32>} : memref<18x18x4xf32, #tpu.memory_space<vmem>>, vector<18x1x4xf32>,
    %c0_20 = arith.constant 0 : index
    %c0_21 = arith.constant 0 : index
    %c0_22 = arith.constant 0 : index
    %12 = vector.load %arg7[%c0_20, %c0_21, %c0_22] : memref<18x18x4xf32, #tpu.memory_space<vmem>>, vector<16x16x4xf32>
    %13 = vector.shape_cast %12 : vector<16x16x4xf32> to vector<256x4xf32>
    %14 = arith.truncf %13 : vector<256x4xf32> to vector<256x4xbf16>
    %c0_23 = arith.constant 0 : index
    %c0_24 = arith.constant 0 : index
    %c0_25 = arith.constant 0 : index
    %15 = vector.load %arg2[%c0_23, %c0_24, %c0_25] : memref<9x4x4xbf16, #tpu.memory_space<vmem>>, vector<1x4x4xbf16>
    %16 = vector.shape_cast %15 : vector<1x4x4xbf16> to vector<4x4xbf16>
    %cst_26 = arith.constant dense<0.000000e+00> : vector<256x4xf32>
    %17 = tpu.matmul %14, %16, %cst_26 {dimension_numbers = #tpu.dot_dimension_numbers<[1], [0], [0], [1], [0, 0, 1, 1], [], []>} : vector<256x4xbf16>, vector<4x4xbf16>, vector<256x4xf32> -> vector<256x4xf32>
    %c0_27 = arith.constant 0 : index
    %c1 = arith.constant 1 : index
    %c0_28 = arith.constant 0 : index
    %18 = vector.load %arg7[%c0_27, %c1, %c0_28] : memref<18x18x4xf32, #tpu.memory_space<vmem>>, vector<16x16x4xf32>
    %19 = vector.shape_cast %18 : vector<16x16x4xf32> to vector<256x4xf32>
    %20 = arith.truncf %19 : vector<256x4xf32> to vector<256x4xbf16>
    %c1_29 = arith.constant 1 : index
    %c0_30 = arith.constant 0 : index
    %c0_31 = arith.constant 0 : index
    %21 = vector.load %arg2[%c1_29, %c0_30, %c0_31] : memref<9x4x4xbf16, #tpu.memory_space<vmem>>, vector<1x4x4xbf16>
    %22 = vector.shape_cast %21 : vector<1x4x4xbf16> to vector<4x4xbf16>
    %cst_32 = arith.constant dense<0.000000e+00> : vector<256x4xf32>
    %23 = tpu.matmul %20, %22, %cst_32 {dimension_numbers = #tpu.dot_dimension_numbers<[1], [0], [0], [1], [0, 0, 1, 1], [], []>} : vector<256x4xbf16>, vector<4x4xbf16>, vector<256x4xf32> -> vector<256x4xf32>
    %24 = arith.addf %17, %23 : vector<256x4xf32>
    %c0_33 = arith.constant 0 : index
    %c2 = arith.constant 2 : index
    %c0_34 = arith.constant 0 : index
    %25 = vector.load %arg7[%c0_33, %c2, %c0_34] : memref<18x18x4xf32, #tpu.memory_space<vmem>>, vector<16x16x4xf32>
    %26 = vector.shape_cast %25 : vector<16x16x4xf32> to vector<256x4xf32>
    %27 = arith.truncf %26 : vector<256x4xf32> to vector<256x4xbf16>
    %c2_35 = arith.constant 2 : index
    %c0_36 = arith.constant 0 : index
    %c0_37 = arith.constant 0 : index
    %28 = vector.load %arg2[%c2_35, %c0_36, %c0_37] : memref<9x4x4xbf16, #tpu.memory_space<vmem>>, vector<1x4x4xbf16>
    %29 = vector.shape_cast %28 : vector<1x4x4xbf16> to vector<4x4xbf16>
    %cst_38 = arith.constant dense<0.000000e+00> : vector<256x4xf32>
    %30 = tpu.matmul %27, %29, %cst_38 {dimension_numbers = #tpu.dot_dimension_numbers<[1], [0], [0], [1], [0, 0, 1, 1], [], []>} : vector<256x4xbf16>, vector<4x4xbf16>, vector<256x4xf32> -> vector<256x4xf32>
    %31 = arith.addf %24, %30 : vector<256x4xf32>
    %c1_39 = arith.constant 1 : index
    %c0_40 = arith.constant 0 : index
    %c0_41 = arith.constant 0 : index
    %32 = vector.load %arg7[%c1_39, %c0_40, %c0_41] : memref<18x18x4xf32, #tpu.memory_space<vmem>>, vector<16x16x4xf32>
    %33 = vector.shape_cast %32 : vector<16x16x4xf32> to vector<256x4xf32>
    %34 = arith.truncf %33 : vector<256x4xf32> to vector<256x4xbf16>
    %c3 = arith.constant 3 : index
    %c0_42 = arith.constant 0 : index
    %c0_43 = arith.constant 0 : index
    %35 = vector.load %arg2[%c3, %c0_42, %c0_43] : memref<9x4x4xbf16, #tpu.memory_space<vmem>>, vector<1x4x4xbf16>
    %36 = vector.shape_cast %35 : vector<1x4x4xbf16> to vector<4x4xbf16>
    %cst_44 = arith.constant dense<0.000000e+00> : vector<256x4xf32>
    %37 = tpu.matmul %34, %36, %cst_44 {dimension_numbers = #tpu.dot_dimension_numbers<[1], [0], [0], [1], [0, 0, 1, 1], [], []>} : vector<256x4xbf16>, vector<4x4xbf16>, vector<256x4xf32> -> vector<256x4xf32>
    %38 = arith.addf %31, %37 : vector<256x4xf32>
    %c1_45 = arith.constant 1 : index
    %c1_46 = arith.constant 1 : index
    %c0_47 = arith.constant 0 : index
    %39 = vector.load %arg7[%c1_45, %c1_46, %c0_47] : memref<18x18x4xf32, #tpu.memory_space<vmem>>, vector<16x16x4xf32>
    %40 = vector.shape_cast %39 : vector<16x16x4xf32> to vector<256x4xf32>
    %41 = arith.truncf %40 : vector<256x4xf32> to vector<256x4xbf16>
    %c4 = arith.constant 4 : index
    %c0_48 = arith.constant 0 : index
    %c0_49 = arith.constant 0 : index
    %42 = vector.load %arg2[%c4, %c0_48, %c0_49] : memref<9x4x4xbf16, #tpu.memory_space<vmem>>, vector<1x4x4xbf16>
    %43 = vector.shape_cast %42 : vector<1x4x4xbf16> to vector<4x4xbf16>
    %cst_50 = arith.constant dense<0.000000e+00> : vector<256x4xf32>
    %44 = tpu.matmul %41, %43, %cst_50 {dimension_numbers = #tpu.dot_dimension_numbers<[1], [0], [0], [1], [0, 0, 1, 1], [], []>} : vector<256x4xbf16>, vector<4x4xbf16>, vector<256x4xf32> -> vector<256x4xf32>
    %45 = arith.addf %38, %44 : vector<256x4xf32>
    %c1_51 = arith.constant 1 : index
    %c2_52 = arith.constant 2 : index
    %c0_53 = arith.constant 0 : index
    %46 = vector.load %arg7[%c1_51, %c2_52, %c0_53] : memref<18x18x4xf32, #tpu.memory_space<vmem>>, vector<16x16x4xf32>
    %47 = vector.shape_cast %46 : vector<16x16x4xf32> to vector<256x4xf32>
    %48 = arith.truncf %47 : vector<256x4xf32> to vector<256x4xbf16>
    %c5 = arith.constant 5 : index
    %c0_54 = arith.constant 0 : index
    %c0_55 = arith.constant 0 : index
    %49 = vector.load %arg2[%c5, %c0_54, %c0_55] : memref<9x4x4xbf16, #tpu.memory_space<vmem>>, vector<1x4x4xbf16>
    %50 = vector.shape_cast %49 : vector<1x4x4xbf16> to vector<4x4xbf16>
    %cst_56 = arith.constant dense<0.000000e+00> : vector<256x4xf32>
    %51 = tpu.matmul %48, %50, %cst_56 {dimension_numbers = #tpu.dot_dimension_numbers<[1], [0], [0], [1], [0, 0, 1, 1], [], []>} : vector<256x4xbf16>, vector<4x4xbf16>, vector<256x4xf32> -> vector<256x4xf32>
    %52 = arith.addf %45, %51 : vector<256x4xf32>
    %c2_57 = arith.constant 2 : index
    %c0_58 = arith.constant 0 : index
    %c0_59 = arith.constant 0 : index
    %53 = vector.load %arg7[%c2_57, %c0_58, %c0_59] : memref<18x18x4xf32, #tpu.memory_space<vmem>>, vector<16x16x4xf32>
    %54 = vector.shape_cast %53 : vector<16x16x4xf32> to vector<256x4xf32>
    %55 = arith.truncf %54 : vector<256x4xf32> to vector<256x4xbf16>
    %c6 = arith.constant 6 : index
    %c0_60 = arith.constant 0 : index
    %c0_61 = arith.constant 0 : index
    %56 = vector.load %arg2[%c6, %c0_60, %c0_61] : memref<9x4x4xbf16, #tpu.memory_space<vmem>>, vector<1x4x4xbf16>
    %57 = vector.shape_cast %56 : vector<1x4x4xbf16> to vector<4x4xbf16>
    %cst_62 = arith.constant dense<0.000000e+00> : vector<256x4xf32>
    %58 = tpu.matmul %55, %57, %cst_62 {dimension_numbers = #tpu.dot_dimension_numbers<[1], [0], [0], [1], [0, 0, 1, 1], [], []>} : vector<256x4xbf16>, vector<4x4xbf16>, vector<256x4xf32> -> vector<256x4xf32>
    %59 = arith.addf %52, %58 : vector<256x4xf32>
    %c2_63 = arith.constant 2 : index
    %c1_64 = arith.constant 1 : index
    %c0_65 = arith.constant 0 : index
    %60 = vector.load %arg7[%c2_63, %c1_64, %c0_65] : memref<18x18x4xf32, #tpu.memory_space<vmem>>, vector<16x16x4xf32>
    %61 = vector.shape_cast %60 : vector<16x16x4xf32> to vector<256x4xf32>
    %62 = arith.truncf %61 : vector<256x4xf32> to vector<256x4xbf16>
    %c7 = arith.constant 7 : index
    %c0_66 = arith.constant 0 : index
    %c0_67 = arith.constant 0 : index
    %63 = vector.load %arg2[%c7, %c0_66, %c0_67] : memref<9x4x4xbf16, #tpu.memory_space<vmem>>, vector<1x4x4xbf16>
    %64 = vector.shape_cast %63 : vector<1x4x4xbf16> to vector<4x4xbf16>
    %cst_68 = arith.constant dense<0.000000e+00> : vector<256x4xf32>
    %65 = tpu.matmul %62, %64, %cst_68 {dimension_numbers = #tpu.dot_dimension_numbers<[1], [0], [0], [1], [0, 0, 1, 1], [], []>} : vector<256x4xbf16>, vector<4x4xbf16>, vector<256x4xf32> -> vector<256x4xf32>
    %66 = arith.addf %59, %65 : vector<256x4xf32>
    %c2_69 = arith.constant 2 : index
    %c2_70 = arith.constant 2 : index
    %c0_71 = arith.constant 0 : index
    %67 = vector.load %arg7[%c2_69, %c2_70, %c0_71] : memref<18x18x4xf32, #tpu.memory_space<vmem>>, vector<16x16x4xf32>
    %68 = vector.shape_cast %67 : vector<16x16x4xf32> to vector<256x4xf32>
    %69 = arith.truncf %68 : vector<256x4xf32> to vector<256x4xbf16>
    %c8 = arith.constant 8 : index
    %c0_72 = arith.constant 0 : index
    %c0_73 = arith.constant 0 : index
    %70 = vector.load %arg2[%c8, %c0_72, %c0_73] : memref<9x4x4xbf16, #tpu.memory_space<vmem>>, vector<1x4x4xbf16>
    %71 = vector.shape_cast %70 : vector<1x4x4xbf16> to vector<4x4xbf16>
    %cst_74 = arith.constant dense<0.000000e+00> : vector<256x4xf32>
    %72 = tpu.matmul %69, %71, %cst_74 {dimension_numbers = #tpu.dot_dimension_numbers<[1], [0], [0], [1], [0, 0, 1, 1], [], []>} : vector<256x4xbf16>, vector<4x4xbf16>, vector<256x4xf32> -> vector<256x4xf32>
    %73 = arith.addf %66, %72 : vector<256x4xf32>
    %c0_75 = arith.constant 0 : index
    %c0_76 = arith.constant 0 : index
    %74 = vector.load %arg3[%c0_75, %c0_76] : memref<1x4xf32, #tpu.memory_space<vmem>>, vector<1x4xf32>
    %75 = vector.broadcast %74 : vector<1x4xf32> to vector<256x4xf32>
    %76 = arith.addf %73, %75 : vector<256x4xf32>
    %cst_77 = arith.constant 0.000000e+00 : f32
    %77 = vector.broadcast %cst_77 : f32 to vector<256x4xf32>
    %78 = arith.maximumf %76, %77 : vector<256x4xf32>
    %79 = vector.shape_cast %78 : vector<256x4xf32> to vector<16x16x4xf32>
    %c1_78 = arith.constant 1 : index
    %c1_79 = arith.constant 1 : index
    %c0_80 = arith.constant 0 : index
    %80 = vector.load %arg8[%c1_78, %c1_79, %c0_80] : memref<18x18x4xf32, #tpu.memory_space<vmem>>, vector<16x16x4xf32>
    tpu.vector_store %arg8[%c1_78, %c1_79, %c0_80], %79 {strides = array<i32>} : memref<18x18x4xf32, #tpu.memory_space<vmem>>, vector<16x16x4xf32>,
    %c0_81 = arith.constant 0 : index
    %c0_82 = arith.constant 0 : index
    %c0_83 = arith.constant 0 : index
    %81 = vector.load %arg8[%c0_81, %c0_82, %c0_83] : memref<18x18x4xf32, #tpu.memory_space<vmem>>, vector<16x16x4xf32>
    %82 = vector.shape_cast %81 : vector<16x16x4xf32> to vector<256x4xf32>
    %83 = arith.truncf %82 : vector<256x4xf32> to vector<256x4xbf16>
    %c0_84 = arith.constant 0 : index
    %c0_85 = arith.constant 0 : index
    %c0_86 = arith.constant 0 : index
    %84 = vector.load %arg4[%c0_84, %c0_85, %c0_86] : memref<9x4x4xbf16, #tpu.memory_space<vmem>>, vector<1x4x4xbf16>
    %85 = vector.shape_cast %84 : vector<1x4x4xbf16> to vector<4x4xbf16>
    %cst_87 = arith.constant dense<0.000000e+00> : vector<256x4xf32>
    %86 = tpu.matmul %83, %85, %cst_87 {dimension_numbers = #tpu.dot_dimension_numbers<[1], [0], [0], [1], [0, 0, 1, 1], [], []>} : vector<256x4xbf16>, vector<4x4xbf16>, vector<256x4xf32> -> vector<256x4xf32>
    %c0_88 = arith.constant 0 : index
    %c1_89 = arith.constant 1 : index
    %c0_90 = arith.constant 0 : index
    %87 = vector.load %arg8[%c0_88, %c1_89, %c0_90] : memref<18x18x4xf32, #tpu.memory_space<vmem>>, vector<16x16x4xf32>
    %88 = vector.shape_cast %87 : vector<16x16x4xf32> to vector<256x4xf32>
    %89 = arith.truncf %88 : vector<256x4xf32> to vector<256x4xbf16>
    %c1_91 = arith.constant 1 : index
    %c0_92 = arith.constant 0 : index
    %c0_93 = arith.constant 0 : index
    %90 = vector.load %arg4[%c1_91, %c0_92, %c0_93] : memref<9x4x4xbf16, #tpu.memory_space<vmem>>, vector<1x4x4xbf16>
    %91 = vector.shape_cast %90 : vector<1x4x4xbf16> to vector<4x4xbf16>
    %cst_94 = arith.constant dense<0.000000e+00> : vector<256x4xf32>
    %92 = tpu.matmul %89, %91, %cst_94 {dimension_numbers = #tpu.dot_dimension_numbers<[1], [0], [0], [1], [0, 0, 1, 1], [], []>} : vector<256x4xbf16>, vector<4x4xbf16>, vector<256x4xf32> -> vector<256x4xf32>
    %93 = arith.addf %86, %92 : vector<256x4xf32>
    %c0_95 = arith.constant 0 : index
    %c2_96 = arith.constant 2 : index
    %c0_97 = arith.constant 0 : index
    %94 = vector.load %arg8[%c0_95, %c2_96, %c0_97] : memref<18x18x4xf32, #tpu.memory_space<vmem>>, vector<16x16x4xf32>
    %95 = vector.shape_cast %94 : vector<16x16x4xf32> to vector<256x4xf32>
    %96 = arith.truncf %95 : vector<256x4xf32> to vector<256x4xbf16>
    %c2_98 = arith.constant 2 : index
    %c0_99 = arith.constant 0 : index
    %c0_100 = arith.constant 0 : index
    %97 = vector.load %arg4[%c2_98, %c0_99, %c0_100] : memref<9x4x4xbf16, #tpu.memory_space<vmem>>, vector<1x4x4xbf16>
    %98 = vector.shape_cast %97 : vector<1x4x4xbf16> to vector<4x4xbf16>
    %cst_101 = arith.constant dense<0.000000e+00> : vector<256x4xf32>
    %99 = tpu.matmul %96, %98, %cst_101 {dimension_numbers = #tpu.dot_dimension_numbers<[1], [0], [0], [1], [0, 0, 1, 1], [], []>} : vector<256x4xbf16>, vector<4x4xbf16>, vector<256x4xf32> -> vector<256x4xf32>
    %100 = arith.addf %93, %99 : vector<256x4xf32>
    %c1_102 = arith.constant 1 : index
    %c0_103 = arith.constant 0 : index
    %c0_104 = arith.constant 0 : index
    %101 = vector.load %arg8[%c1_102, %c0_103, %c0_104] : memref<18x18x4xf32, #tpu.memory_space<vmem>>, vector<16x16x4xf32>
    %102 = vector.shape_cast %101 : vector<16x16x4xf32> to vector<256x4xf32>
    %103 = arith.truncf %102 : vector<256x4xf32> to vector<256x4xbf16>
    %c3_105 = arith.constant 3 : index
    %c0_106 = arith.constant 0 : index
    %c0_107 = arith.constant 0 : index
    %104 = vector.load %arg4[%c3_105, %c0_106, %c0_107] : memref<9x4x4xbf16, #tpu.memory_space<vmem>>, vector<1x4x4xbf16>
    %105 = vector.shape_cast %104 : vector<1x4x4xbf16> to vector<4x4xbf16>
    %cst_108 = arith.constant dense<0.000000e+00> : vector<256x4xf32>
    %106 = tpu.matmul %103, %105, %cst_108 {dimension_numbers = #tpu.dot_dimension_numbers<[1], [0], [0], [1], [0, 0, 1, 1], [], []>} : vector<256x4xbf16>, vector<4x4xbf16>, vector<256x4xf32> -> vector<256x4xf32>
    %107 = arith.addf %100, %106 : vector<256x4xf32>
    %c1_109 = arith.constant 1 : index
    %c1_110 = arith.constant 1 : index
    %c0_111 = arith.constant 0 : index
    %108 = vector.load %arg8[%c1_109, %c1_110, %c0_111] : memref<18x18x4xf32, #tpu.memory_space<vmem>>, vector<16x16x4xf32>
    %109 = vector.shape_cast %108 : vector<16x16x4xf32> to vector<256x4xf32>
    %110 = arith.truncf %109 : vector<256x4xf32> to vector<256x4xbf16>
    %c4_112 = arith.constant 4 : index
    %c0_113 = arith.constant 0 : index
    %c0_114 = arith.constant 0 : index
    %111 = vector.load %arg4[%c4_112, %c0_113, %c0_114] : memref<9x4x4xbf16, #tpu.memory_space<vmem>>, vector<1x4x4xbf16>
    %112 = vector.shape_cast %111 : vector<1x4x4xbf16> to vector<4x4xbf16>
    %cst_115 = arith.constant dense<0.000000e+00> : vector<256x4xf32>
    %113 = tpu.matmul %110, %112, %cst_115 {dimension_numbers = #tpu.dot_dimension_numbers<[1], [0], [0], [1], [0, 0, 1, 1], [], []>} : vector<256x4xbf16>, vector<4x4xbf16>, vector<256x4xf32> -> vector<256x4xf32>
    %114 = arith.addf %107, %113 : vector<256x4xf32>
    %c1_116 = arith.constant 1 : index
    %c2_117 = arith.constant 2 : index
    %c0_118 = arith.constant 0 : index
    %115 = vector.load %arg8[%c1_116, %c2_117, %c0_118] : memref<18x18x4xf32, #tpu.memory_space<vmem>>, vector<16x16x4xf32>
    %116 = vector.shape_cast %115 : vector<16x16x4xf32> to vector<256x4xf32>
    %117 = arith.truncf %116 : vector<256x4xf32> to vector<256x4xbf16>
    %c5_119 = arith.constant 5 : index
    %c0_120 = arith.constant 0 : index
    %c0_121 = arith.constant 0 : index
    %118 = vector.load %arg4[%c5_119, %c0_120, %c0_121] : memref<9x4x4xbf16, #tpu.memory_space<vmem>>, vector<1x4x4xbf16>
    %119 = vector.shape_cast %118 : vector<1x4x4xbf16> to vector<4x4xbf16>
    %cst_122 = arith.constant dense<0.000000e+00> : vector<256x4xf32>
    %120 = tpu.matmul %117, %119, %cst_122 {dimension_numbers = #tpu.dot_dimension_numbers<[1], [0], [0], [1], [0, 0, 1, 1], [], []>} : vector<256x4xbf16>, vector<4x4xbf16>, vector<256x4xf32> -> vector<256x4xf32>
    %121 = arith.addf %114, %120 : vector<256x4xf32>
    %c2_123 = arith.constant 2 : index
    %c0_124 = arith.constant 0 : index
    %c0_125 = arith.constant 0 : index
    %122 = vector.load %arg8[%c2_123, %c0_124, %c0_125] : memref<18x18x4xf32, #tpu.memory_space<vmem>>, vector<16x16x4xf32>
    %123 = vector.shape_cast %122 : vector<16x16x4xf32> to vector<256x4xf32>
    %124 = arith.truncf %123 : vector<256x4xf32> to vector<256x4xbf16>
    %c6_126 = arith.constant 6 : index
    %c0_127 = arith.constant 0 : index
    %c0_128 = arith.constant 0 : index
    %125 = vector.load %arg4[%c6_126, %c0_127, %c0_128] : memref<9x4x4xbf16, #tpu.memory_space<vmem>>, vector<1x4x4xbf16>
    %126 = vector.shape_cast %125 : vector<1x4x4xbf16> to vector<4x4xbf16>
    %cst_129 = arith.constant dense<0.000000e+00> : vector<256x4xf32>
    %127 = tpu.matmul %124, %126, %cst_129 {dimension_numbers = #tpu.dot_dimension_numbers<[1], [0], [0], [1], [0, 0, 1, 1], [], []>} : vector<256x4xbf16>, vector<4x4xbf16>, vector<256x4xf32> -> vector<256x4xf32>
    %128 = arith.addf %121, %127 : vector<256x4xf32>
    %c2_130 = arith.constant 2 : index
    %c1_131 = arith.constant 1 : index
    %c0_132 = arith.constant 0 : index
    %129 = vector.load %arg8[%c2_130, %c1_131, %c0_132] : memref<18x18x4xf32, #tpu.memory_space<vmem>>, vector<16x16x4xf32>
    %130 = vector.shape_cast %129 : vector<16x16x4xf32> to vector<256x4xf32>
    %131 = arith.truncf %130 : vector<256x4xf32> to vector<256x4xbf16>
    %c7_133 = arith.constant 7 : index
    %c0_134 = arith.constant 0 : index
    %c0_135 = arith.constant 0 : index
    %132 = vector.load %arg4[%c7_133, %c0_134, %c0_135] : memref<9x4x4xbf16, #tpu.memory_space<vmem>>, vector<1x4x4xbf16>
    %133 = vector.shape_cast %132 : vector<1x4x4xbf16> to vector<4x4xbf16>
    %cst_136 = arith.constant dense<0.000000e+00> : vector<256x4xf32>
    %134 = tpu.matmul %131, %133, %cst_136 {dimension_numbers = #tpu.dot_dimension_numbers<[1], [0], [0], [1], [0, 0, 1, 1], [], []>} : vector<256x4xbf16>, vector<4x4xbf16>, vector<256x4xf32> -> vector<256x4xf32>
    %135 = arith.addf %128, %134 : vector<256x4xf32>
    %c2_137 = arith.constant 2 : index
    %c2_138 = arith.constant 2 : index
    %c0_139 = arith.constant 0 : index
    %136 = vector.load %arg8[%c2_137, %c2_138, %c0_139] : memref<18x18x4xf32, #tpu.memory_space<vmem>>, vector<16x16x4xf32>
    %137 = vector.shape_cast %136 : vector<16x16x4xf32> to vector<256x4xf32>
    %138 = arith.truncf %137 : vector<256x4xf32> to vector<256x4xbf16>
    %c8_140 = arith.constant 8 : index
    %c0_141 = arith.constant 0 : index
    %c0_142 = arith.constant 0 : index
    %139 = vector.load %arg4[%c8_140, %c0_141, %c0_142] : memref<9x4x4xbf16, #tpu.memory_space<vmem>>, vector<1x4x4xbf16>
    %140 = vector.shape_cast %139 : vector<1x4x4xbf16> to vector<4x4xbf16>
    %cst_143 = arith.constant dense<0.000000e+00> : vector<256x4xf32>
    %141 = tpu.matmul %138, %140, %cst_143 {dimension_numbers = #tpu.dot_dimension_numbers<[1], [0], [0], [1], [0, 0, 1, 1], [], []>} : vector<256x4xbf16>, vector<4x4xbf16>, vector<256x4xf32> -> vector<256x4xf32>
    %142 = arith.addf %135, %141 : vector<256x4xf32>
    %c0_144 = arith.constant 0 : index
    %c0_145 = arith.constant 0 : index
    %143 = vector.load %arg5[%c0_144, %c0_145] : memref<1x4xf32, #tpu.memory_space<vmem>>, vector<1x4xf32>
    %144 = vector.broadcast %143 : vector<1x4xf32> to vector<256x4xf32>
    %145 = arith.addf %142, %144 : vector<256x4xf32>
    %c1_146 = arith.constant 1 : index
    %c1_147 = arith.constant 1 : index
    %c0_148 = arith.constant 0 : index
    %146 = vector.load %arg7[%c1_146, %c1_147, %c0_148] : memref<18x18x4xf32, #tpu.memory_space<vmem>>, vector<16x16x4xf32>
    %147 = vector.shape_cast %146 : vector<16x16x4xf32> to vector<256x4xf32>
    %148 = arith.addf %145, %147 : vector<256x4xf32>
    %cst_149 = arith.constant 0.000000e+00 : f32
    %149 = vector.broadcast %cst_149 : f32 to vector<256x4xf32>
    %150 = arith.maximumf %148, %149 : vector<256x4xf32>
    %c0_150 = arith.constant 0 : index
    %c0_151 = arith.constant 0 : index
    %c0_152 = arith.constant 0 : index
    %151 = vector.load %arg6[%c0_150, %c0_151, %c0_152] : memref<1x256x4xf32, #tpu.memory_space<vmem>>, vector<1x256x4xf32>
    %152 = vector.shape_cast %151 : vector<1x256x4xf32> to vector<256x4xf32>
    %153 = vector.shape_cast %150 : vector<256x4xf32> to vector<1x256x4xf32>
    tpu.vector_store %arg6[%c0_150, %c0_151, %c0_152], %153 {strides = array<i32>} : memref<1x256x4xf32, #tpu.memory_space<vmem>>, vector<1x256x4xf32>,
    return
  }
  func.func @transform_0(%arg0: i32) -> (i32, i32, i32, i32) {
    %c0_i32 = arith.constant 0 : i32
    %c0_i32_0 = arith.constant 0 : i32
    %c0_i32_1 = arith.constant 0 : i32
    %c0_i32_2 = arith.constant 0 : i32
    return %arg0, %c0_i32, %c0_i32_0, %c0_i32_1 : i32, i32, i32, i32
  }
  func.func @transform_1(%arg0: i32) -> (i32, i32, i32) {
    %c0_i32 = arith.constant 0 : i32
    %c0_i32_0 = arith.constant 0 : i32
    %c0_i32_1 = arith.constant 0 : i32
    %c0_i32_2 = arith.constant 0 : i32
    return %c0_i32, %c0_i32_0, %c0_i32_1 : i32, i32, i32
  }
  func.func @transform_2(%arg0: i32) -> (i32, i32) {
    %c0_i32 = arith.constant 0 : i32
    %c0_i32_0 = arith.constant 0 : i32
    %c0_i32_1 = arith.constant 0 : i32
    return %c0_i32, %c0_i32_0 : i32, i32
  }
  func.func @transform_3(%arg0: i32) -> (i32, i32, i32) {
    %c0_i32 = arith.constant 0 : i32
    %c0_i32_0 = arith.constant 0 : i32
    %c0_i32_1 = arith.constant 0 : i32
    %c0_i32_2 = arith.constant 0 : i32
    return %c0_i32, %c0_i32_0, %c0_i32_1 : i32, i32, i32
  }
  func.func @transform_4(%arg0: i32) -> (i32, i32) {
    %c0_i32 = arith.constant 0 : i32
    %c0_i32_0 = arith.constant 0 : i32
    %c0_i32_1 = arith.constant 0 : i32
    return %c0_i32, %c0_i32_0 : i32, i32
  }
  func.func @transform_5(%arg0: i32) -> (i32, i32, i32) {
    %c0_i32 = arith.constant 0 : i32
    %c0_i32_0 = arith.constant 0 : i32
    %c0_i32_1 = arith.constant 0 : i32
    return %arg0, %c0_i32, %c0_i32_0 : i32, i32, i32
  }
}

</mosaic_0001>

<bundles_post_ra>
// kernel: residual_block_forward.1
= control target key start
LH: loop header
LB: loop body
LE: loop exit
PB: predicated region body
PF: predicated region fallthrough
CT: control target
= control target key end

     0   :  { %s7784_s18 = smov 0   ;;  %s8961_s0 = inlined_call_operand.vmem [shape: bf16[2,18,18,4], index: 0, kind: input, shape index: {}]   ;;  %s8962_s1 = inlined_call_operand.vmem [shape: bf16[9,4,4], index: 1, kind: input, shape index: {}]   ;;  %s8963_s2 = inlined_call_operand.vmem [shape: f32[1,4], index: 2, kind: input, shape index: {}]   ;;  %s8964_s3 = inlined_call_operand.vmem [shape: bf16[9,4,4], index: 3, kind: input, shape index: {}]   ;;  %s8965_s4 = inlined_call_operand.vmem [shape: f32[1,4], index: 4, kind: input, shape index: {}]   ;;  %s8966_s5 = inlined_call_operand.vmem [shape: f32[2,256,4], index: 5, kind: output, shape index: {}]  }
   0x1 LB: > { %s5926_s19 = sadd.s32 4294967295, %s7751_s18   ;;  %p5930_p0 = scmp.ge.s32.totalorder %s7751_s18, 1  ;;  %s7751_s18 = sphi %s7784_s18, %s15_s18  }
   0x2   : > { %p187_p1 = scmp.lt.s32.totalorder %s7751_s18, 3 }
   0x4   : > { %p188_p2 = pnand %p5930_p0, %p187_p1 }
   0x5   : > { %v5934_v0 = vld [vmem:[%s8962_s1 + $0x2] sm:$0x3] (!%p188_p2)  ;;  %vm581_vm0 = vcmask (!%p188_p2), 1041408   ;;  %p215_p3 = scmp.lt.s32.totalorder (!%p188_p2), %s5926_s19, 1  ;;  %v482_v2 = vld [vmem:[%s8962_s1] sm:$0x3] (!%p188_p2) }
   0x6   : > { %191 = sbr.rel (%p188_p2) target bundleno = 1567 (0x61f), region = 40  ;;  %7717 = vmatprep.subr.msk.bf16.mxu0 (!%p188_p2), %vm581_vm0, %v5934_v0  ;;  %v583_v1 = vsel (!%p188_p2), %vm581_vm0, %v5934_v0, 0  ;;  %vm334_vm1 = vcmask (!%p188_p2), 31744   ;;  %vm337_vm2 = vcmask (!%p188_p2), 25600   ;;  %v7813_v6 = vsel (!%p188_p2), %vm581_vm0, %v482_v2, 0 }
   0x7   : > { %6594 = vmatpush3.bf16.msra.mxu0 (!%p188_p2), %v583_v1  ;;  %vm397_vm3 = vcmask (!%p188_p2), 24576  }
   0x8   : > { %7718 = vmatprep.subr.msk.bf16.mxu0 (!%p188_p2), %vm581_vm0, %v482_v2 }
   0xd   : > { %s8968_s19 = smov (!%p215_p3, %s5926_s19), 1 }
   0xe   : > { %s7735_s24 = smul.u32 216, %s8968_s19  ;;  %s6242_s16 = sshll.u32 %s8968_s19, 8 }
   0xf   : > { %s8863_s21 = scalar_lea.vmem %s8966_s5, %s6242_s16 }
  0x10   : > { %s7807_s27 = scalar_lea.vmem %s8961_s0, %s7735_s24 }
  0x11   : > { %v6244_v3 = vld [vmem:[%s7807_s27] sm:$0xff]   ;;  %v228_v4 = vld [vmem:[%s7807_s27 + $0x8] sm:$0x1]  ;;  %v229_v5 = vld [vmem:[%s7807_s27 + $0xc] sm:$0xff]  }
  0x12   : > { %v6245_v7 = vunpack.c.l.bf16 %v6244_v3  ;;  %v6246_v8 = vunpack.c.h.bf16 %v6244_v3  ;;  %v282_v9 = vunpack.c.l.bf16 %v228_v4  ;;  %v231_v10 = vld [vmem:[%s7807_s27 + $0x14] sm:$0x1]  ;;  %v283_v11 = vunpack.c.l.bf16 %v229_v5  ;;  %v6279_v12 = vld [vmem:[%s7807_s27 + $0x18] sm:$0xff]   ;;  %v234_v13 = vld [vmem:[%s7807_s27 + $0x20] sm:$0x1] }
  0x13   : > { %v284_v14 = vunpack.c.h.bf16 %v229_v5  ;;  %v285_v15 = vunpack.c.l.bf16 %v231_v10  ;;  %v6249_v16 = vunpack.c.l.bf16 %v6279_v12  ;;  %v6250_v17 = vunpack.c.h.bf16 %v6279_v12  ;;  %v235_v18 = vld [vmem:[%s7807_s27 + $0x24] sm:$0xff]   ;;  %v237_v19 = vld [vmem:[%s7807_s27 + $0x2c] sm:$0x1]  ;;  %v6280_v20 = vld [vmem:[%s7807_s27 + $0x30] sm:$0xff]  }
  0x14   : > { %335 = vst.msk [vmem:[#allocation2] sm:$0xff] %vm334_vm1, %v6245_v7  ;;  %336 = vst.msk [vmem:[#allocation2 + $0x8] sm:$0xff] %vm334_vm1, %v6246_v8  ;;  %v288_v21 = vunpack.c.l.bf16 %v234_v13  ;;  %v289_v22 = vunpack.c.l.bf16 %v235_v18  ;;  %v290_v23 = vunpack.c.h.bf16 %v235_v18  ;;  %v291_v24 = vunpack.c.l.bf16 %v237_v19  ;;  %v240_v25 = vld [vmem:[%s7807_s27 + $0x38] sm:$0x1]  ;;  %v241_v26 = vld [vmem:[%s7807_s27 + $0x3c] sm:$0xff]  }
  0x15   : > { %338 = vst.msk [vmem:[#allocation2 + $0x10] sm:$0x3] %vm337_vm2, %v282_v9  ;;  %v243_v27 = vld [vmem:[%s7807_s27 + $0x44] sm:$0x1]  ;;  %341 = vst.msk [vmem:[#allocation2 + $0x28] sm:$0x3] %vm337_vm2, %v285_v15  ;;  %v6253_v28 = vunpack.c.l.bf16 %v6280_v20  ;;  %v6254_v29 = vunpack.c.h.bf16 %v6280_v20  ;;  %v294_v30 = vunpack.c.l.bf16 %v240_v25  ;;  %v295_v31 = vunpack.c.l.bf16 %v241_v26 }
  0x16   : > { %339 = vst.msk [vmem:[#allocation2 + $0x18] sm:$0xff] %vm334_vm1, %v283_v11  ;;  %340 = vst.msk [vmem:[#allocation2 + $0x20] sm:$0xff] %vm334_vm1, %v284_v14  ;;  %v6281_v32 = vld [vmem:[%s7807_s27 + $0x48] sm:$0xff]   ;;  %v246_v33 = vld [vmem:[%s7807_s27 + $0x50] sm:$0x1]  ;;  %v296_v35 = vunpack.c.h.bf16 %v241_v26  ;;  %v297_v36 = vunpack.c.l.bf16 %v243_v27 }
  0x17   : > { %342 = vst.msk [vmem:[#allocation2 + $0x30] sm:$0xff] %vm334_vm1, %v6249_v16  ;;  %343 = vst.msk [vmem:[#allocation2 + $0x38] sm:$0xff] %vm334_vm1, %v6250_v17  ;;  %v247_v34 = vld [vmem:[%s7807_s27 + $0x54] sm:$0xff]   ;;  %v6257_v37 = vunpack.c.l.bf16 %v6281_v32  ;;  %v6258_v38 = vunpack.c.h.bf16 %v6281_v32  ;;  %v249_v39 = vld [vmem:[%s7807_s27 + $0x5c] sm:$0x1]  ;;  %v300_v42 = vunpack.c.l.bf16 %v246_v33 }
  0x18   : > { %344 = vst.msk [vmem:[#allocation2 + $0x40] sm:$0x3] %vm337_vm2, %v288_v21  ;;  %347 = vst.msk [vmem:[#allocation2 + $0x58] sm:$0x3] %vm337_vm2, %v291_v24  ;;  %v6282_v40 = vld [vmem:[%s7807_s27 + $0x60] sm:$0xff]   ;;  %v301_v43 = vunpack.c.l.bf16 %v247_v34  ;;  %v302_v44 = vunpack.c.h.bf16 %v247_v34  ;;  %v303_v45 = vunpack.c.l.bf16 %v249_v39  ;;  %v253_v46 = vld [vmem:[%s7807_s27 + $0x6c] sm:$0xff]  }
  0x19   : > { %345 = vst.msk [vmem:[#allocation2 + $0x48] sm:$0xff] %vm334_vm1, %v289_v22  ;;  %346 = vst.msk [vmem:[#allocation2 + $0x50] sm:$0xff] %vm334_vm1, %v290_v23  ;;  %v252_v41 = vld [vmem:[%s7807_s27 + $0x68] sm:$0x1]  ;;  %v255_v47 = vld [vmem:[%s7807_s27 + $0x74] sm:$0x1]  ;;  %v6261_v49 = vunpack.c.l.bf16 %v6282_v40  ;;  %v6262_v50 = vunpack.c.h.bf16 %v6282_v40  ;;  %v307_v52 = vunpack.c.l.bf16 %v253_v46  ;;  %v308_v56 = vunpack.c.h.bf16 %v253_v46 }
  0x1a   : > { %348 = vst.msk [vmem:[#allocation2 + $0x60] sm:$0xff] %vm334_vm1, %v6253_v28  ;;  %349 = vst.msk [vmem:[#allocation2 + $0x68] sm:$0xff] %vm334_vm1, %v6254_v29  ;;  %v6283_v48 = vld [vmem:[%s7807_s27 + $0x78] sm:$0xff]   ;;  %v306_v51 = vunpack.c.l.bf16 %v252_v41  ;;  %v258_v53 = vld [vmem:[%s7807_s27 + $0x80] sm:$0x1]  ;;  %v309_v57 = vunpack.c.l.bf16 %v255_v47 }
  0x1b   : > { %350 = vst.msk [vmem:[#allocation2 + $0x70] sm:$0x3] %vm337_vm2, %v294_v30  ;;  %353 = vst.msk [vmem:[#allocation2 + $0x88] sm:$0x3] %vm337_vm2, %v297_v36  ;;  %v259_v54 = vld [vmem:[%s7807_s27 + $0x84] sm:$0xff]   ;;  %v6265_v58 = vunpack.c.l.bf16 %v6283_v48  ;;  %v6266_v59 = vunpack.c.h.bf16 %v6283_v48  ;;  %v6284_v60 = vld [vmem:[%s7807_s27 + $0x90] sm:$0xff]   ;;  %v312_v63 = vunpack.c.l.bf16 %v258_v53 }
  0x1c   : > { %351 = vst.msk [vmem:[#allocation2 + $0x78] sm:$0xff] %vm334_vm1, %v295_v31  ;;  %352 = vst.msk [vmem:[#allocation2 + $0x80] sm:$0xff] %vm334_vm1, %v296_v35  ;;  %v261_v55 = vld [vmem:[%s7807_s27 + $0x8c] sm:$0x1]  ;;  %v264_v61 = vld [vmem:[%s7807_s27 + $0x98] sm:$0x1]  ;;  %v313_v0 = vunpack.c.l.bf16 %v259_v54  ;;  %v314_v1 = vunpack.c.h.bf16 %v259_v54  ;;  %v6269_v9 = vunpack.c.l.bf16 %v6284_v60  ;;  %v6270_v10 = vunpack.c.h.bf16 %v6284_v60 }
  0x1d   : > { %354 = vst.msk [vmem:[#allocation2 + $0x90] sm:$0xff] %vm334_vm1, %v6257_v37  ;;  %355 = vst.msk [vmem:[#allocation2 + $0x98] sm:$0xff] %vm334_vm1, %v6258_v38  ;;  %v265_v62 = vld [vmem:[%s7807_s27 + $0x9c] sm:$0xff]   ;;  %v315_v2 = vunpack.c.l.bf16 %v261_v55  ;;  %v267_v3 = vld [vmem:[%s7807_s27 + $0xa4] sm:$0x1]  ;;  %v318_v11 = vunpack.c.l.bf16 %v264_v61 }
  0x1e   : > { %356 = vst.msk [vmem:[#allocation2 + $0xa0] sm:$0x3] %vm337_vm2, %v300_v42  ;;  %359 = vst.msk [vmem:[#allocation2 + $0xb8] sm:$0x3] %vm337_vm2, %v303_v45  ;;  %v6285_v4 = vld [vmem:[%s7807_s27 + $0xa8] sm:$0xff]   ;;  %v319_v12 = vunpack.c.l.bf16 %v265_v62  ;;  %v271_v13 = vld [vmem:[%s7807_s27 + $0xb4] sm:$0xff]   ;;  %v320_v18 = vunpack.c.h.bf16 %v265_v62  ;;  %v321_v19 = vunpack.c.l.bf16 %v267_v3 }
  0x1f   : > { %357 = vst.msk [vmem:[#allocation2 + $0xa8] sm:$0xff] %vm334_vm1, %v301_v43  ;;  %358 = vst.msk [vmem:[#allocation2 + $0xb0] sm:$0xff] %vm334_vm1, %v302_v44  ;;  %v270_v5 = vld [vmem:[%s7807_s27 + $0xb0] sm:$0x1]  ;;  %v483_v7 = vld [vmem:[#allocation2 + $0x1] sm:$0xff]  ;;  %v6273_v20 = vunpack.c.l.bf16 %v6285_v4  ;;  %v6274_v23 = vunpack.c.h.bf16 %v6285_v4  ;;  %v325_v25 = vunpack.c.l.bf16 %v271_v13  ;;  %v326_v28 = vunpack.c.h.bf16 %v271_v13 }
  0x20   : > { %360 = vst.msk [vmem:[#allocation2 + $0xc0] sm:$0xff] %vm334_vm1, %v6261_v49  ;;  %361 = vst.msk [vmem:[#allocation2 + $0xc8] sm:$0xff] %vm334_vm1, %v6262_v50  ;;  %v484_v8 = vld [vmem:[#allocation2 + $0x9] sm:$0xff]  ;;  %v485_v15 = vld [vmem:[#allocation2 + $0x19] sm:$0xff]  ;;  %v324_v24 = vunpack.c.l.bf16 %v270_v5 }
  0x21   : > { %362 = vst.msk [vmem:[#allocation2 + $0xd0] sm:$0x3] %vm337_vm2, %v306_v51  ;;  %365 = vst.msk [vmem:[#allocation2 + $0xe8] sm:$0x3] %vm337_vm2, %v309_v57  ;;  %v515_v14 = vpack.c.bf16 %v484_v8, %v483_v7  ;;  %v486_v16 = vld [vmem:[#allocation2 + $0x21] sm:$0xff]  ;;  %v487_v17 = vld [vmem:[#allocation2 + $0x31] sm:$0xff] }
  0x22   : > { %363 = vst.msk [vmem:[#allocation2 + $0xd8] sm:$0xff] %vm334_vm1, %v307_v52  ;;  %364 = vst.msk [vmem:[#allocation2 + $0xe0] sm:$0xff] %vm334_vm1, %v308_v56  ;;  %v7879_v21 = vpack.c.bf16 %v486_v16, %v485_v15  ;;  %v488_v22 = vld [vmem:[#allocation2 + $0x39] sm:$0xff]  ;;  %v7895_v29 = vld [vmem:[%s8962_s1 + $0x4] sm:$0x3] }
  0x23   : > { %366 = vst.msk [vmem:[#allocation2 + $0xf0] sm:$0xff] %vm334_vm1, %v6265_v58  ;;  %367 = vst.msk [vmem:[#allocation2 + $0xf8] sm:$0xff] %vm334_vm1, %v6266_v59  ;;  %6595 = vmatprep.mubr.msk.bf16.mxu0 %vm334_vm1, %v515_v14  ;;  %v7886_v26 = vpack.c.bf16 %v488_v22, %v487_v17  ;;  %v273_v27 = vld [vmem:[%s7807_s27 + $0xbc] sm:$0x1]  ;;  %v489_v31 = vld [vmem:[#allocation2 + $0x49] sm:$0xff]  ;;  %v1057_v15 = vsel %vm581_vm0, %v7895_v29, 0 }
  0x24   : > { %368 = vst.msk [vmem:[#allocation2 + $0x100] sm:$0x3] %vm337_vm2, %v312_v63  ;;  %371 = vst.msk [vmem:[#allocation2 + $0x118] sm:$0x3] %vm337_vm2, %v315_v2  ;;  %6596 = vmatmul.mubr.msk.bf16.vlgmr.msra.gmra.mrb[0].mxu0 %vm334_vm1, %v7879_v21  ;;  %v327_v30 = vunpack.c.l.bf16 %v273_v27  ;;  %v490_v32 = vld [vmem:[#allocation2 + $0x51] sm:$0xff]  ;;  %v491_v33 = vld [vmem:[#allocation2 + $0x61] sm:$0xff] }
  0x25   : > { %369 = vst.msk [vmem:[#allocation2 + $0x108] sm:$0xff] %vm334_vm1, %v313_v0  ;;  %370 = vst.msk [vmem:[#allocation2 + $0x110] sm:$0xff] %vm334_vm1, %v314_v1  ;;  %6628 = vmatpush3.bf16.msra.mxu0 %v7813_v6  ;;  %6599 = vmatprep.mubr.msk.bf16.mxu0 %vm334_vm1, %v7886_v26  ;;  %v492_v34 = vld [vmem:[#allocation2 + $0x69] sm:$0xff]  ;;  %v7909_v35 = vpack.c.bf16 %v490_v32, %v489_v31  ;;  %v493_v6 = vld [vmem:[#allocation2 + $0x79] sm:$0xff] }
  0x26   : > { %372 = vst.msk [vmem:[#allocation2 + $0x120] sm:$0xff] %vm334_vm1, %v6269_v9  ;;  %373 = vst.msk [vmem:[#allocation2 + $0x128] sm:$0xff] %vm334_vm1, %v6270_v10  ;;  %7719 = vmatprep.subr.msk.bf16.mxu0 %vm581_vm0, %v7895_v29  ;;  %v7911_v36 = vpack.c.bf16 %v492_v34, %v491_v33  ;;  %v494_v37 = vld [vmem:[#allocation2 + $0x81] sm:$0xff]  ;;  %v495_v38 = vld [vmem:[#allocation2 + $0x91] sm:$0xff] }
  0x27   : > { %374 = vst.msk [vmem:[#allocation2 + $0x130] sm:$0x3] %vm337_vm2, %v318_v11  ;;  %377 = vst.msk [vmem:[#allocation2 + $0x148] sm:$0x3] %vm337_vm2, %v321_v19  ;;  %v496_v39 = vld [vmem:[#allocation2 + $0x99] sm:$0xff]  ;;  %v7917_v40 = vpack.c.bf16 %v494_v37, %v493_v6  ;;  %v497_v42 = vld [vmem:[#allocation2 + $0xa9] sm:$0xff] }
  0x28   : > { %375 = vst.msk [vmem:[#allocation2 + $0x138] sm:$0xff] %vm334_vm1, %v319_v12  ;;  %376 = vst.msk [vmem:[#allocation2 + $0x140] sm:$0xff] %vm334_vm1, %v320_v18  ;;  %v7919_v41 = vpack.c.bf16 %v496_v39, %v495_v38  ;;  %v498_v43 = vld [vmem:[#allocation2 + $0xb1] sm:$0xff]  ;;  %v499_v44 = vld [vmem:[#allocation2 + $0xc1] sm:$0xff] }
  0x29   : > { %378 = vst.msk [vmem:[#allocation2 + $0x150] sm:$0xff] %vm334_vm1, %v6273_v20  ;;  %379 = vst.msk [vmem:[#allocation2 + $0x158] sm:$0xff] %vm334_vm1, %v6274_v23  ;;  %v500_v45 = vld [vmem:[#allocation2 + $0xc9] sm:$0xff]  ;;  %v7925_v46 = vpack.c.bf16 %v498_v43, %v497_v42  ;;  %v501_v48 = vld [vmem:[#allocation2 + $0xd9] sm:$0xff] }
  0x2a   : > { %380 = vst.msk [vmem:[#allocation2 + $0x160] sm:$0x3] %vm337_vm2, %v324_v24  ;;  %383 = vst.msk [vmem:[#allocation2 + $0x178] sm:$0x3] %vm337_vm2, %v327_v30  ;;  %v7927_v47 = vpack.c.bf16 %v500_v45, %v499_v44  ;;  %v502_v49 = vld [vmem:[#allocation2 + $0xe1] sm:$0xff]  ;;  %v503_v50 = vld [vmem:[#allocation2 + $0xf1] sm:$0xff] }
  0x2b   : > { %381 = vst.msk [vmem:[#allocation2 + $0x168] sm:$0xff] %vm334_vm1, %v325_v25  ;;  %382 = vst.msk [vmem:[#allocation2 + $0x170] sm:$0xff] %vm334_vm1, %v326_v28  ;;  %v504_v51 = vld [vmem:[#allocation2 + $0xf9] sm:$0xff]  ;;  %v7933_v52 = vpack.c.bf16 %v502_v49, %v501_v48  ;;  %v435_v5 = vld [vmem:[#allocation2 + $0x8] sm:$0xff] }
  0x2c   : > { %6600 = vmatmul.mubr.msk.bf16.gmra.mrb[4].mxu0 %vm334_vm1, %v7909_v35  ;;  %v7935_v53 = vpack.c.bf16 %v504_v51, %v503_v50  ;;  %v505_v54 = vld [vmem:[#allocation2 + $0x109] sm:$0xff]  ;;  %v506_v55 = vld [vmem:[#allocation2 + $0x111] sm:$0xff]  ;;  %v434_v4 = vld [vmem:[#allocation2] sm:$0xff] }
  0x2d   : > { %6603 = vmatprep.mubr.msk.bf16.mxu0 %vm334_vm1, %v7911_v36  ;;  %v507_v56 = vld [vmem:[#allocation2 + $0x121] sm:$0xff]  ;;  %v7941_v58 = vpack.c.bf16 %v506_v55, %v505_v54  ;;  %v466_v8 = vpack.c.bf16 %v435_v5, %v434_v4  ;;  %v436_v9 = vld [vmem:[#allocation2 + $0x18] sm:$0xff]  ;;  %v438_v11 = vld [vmem:[#allocation2 + $0x30] sm:$0xff] }
  0x2e   : > { %v508_v57 = vld [vmem:[#allocation2 + $0x129] sm:$0xff]  ;;  %v437_v10 = vld [vmem:[#allocation2 + $0x20] sm:$0xff]  ;;  %v439_v12 = vld [vmem:[#allocation2 + $0x38] sm:$0xff] }
  0x2f   : > { %v7943_v59 = vpack.c.bf16 %v508_v57, %v507_v56  ;;  %v509_v60 = vld [vmem:[#allocation2 + $0x139] sm:$0xff]  ;;  %v510_v61 = vld [vmem:[#allocation2 + $0x141] sm:$0xff]  ;;  %v7962_v13 = vpack.c.bf16 %v437_v10, %v436_v9  ;;  %v7964_v14 = vpack.c.bf16 %v439_v12, %v438_v11  ;;  %v441_v18 = vld [vmem:[#allocation2 + $0x50] sm:$0xff] }
  0x30   : > { %v511_v62 = vld [vmem:[#allocation2 + $0x151] sm:$0xff]  ;;  %v7949_v0 = vpack.c.bf16 %v510_v61, %v509_v60  ;;  %v7971_v16 = vld [vmem:[%s8962_s1 + $0x6] sm:$0x3]  ;;  %v440_v17 = vld [vmem:[#allocation2 + $0x48] sm:$0xff] }
  0x31   : > { %v512_v63 = vld [vmem:[#allocation2 + $0x159] sm:$0xff]  ;;  %v443_v20 = vld [vmem:[#allocation2 + $0x68] sm:$0xff]  ;;  %v7979_v22 = vpack.c.bf16 %v441_v18, %v440_v17  ;;  %v446_v27 = vld [vmem:[#allocation2 + $0x90] sm:$0xff] }
  0x32   : > { %v7951_v1 = vpack.c.bf16 %v512_v63, %v511_v62  ;;  %v513_v2 = vld [vmem:[#allocation2 + $0x169] sm:$0xff]  ;;  %v514_v3 = vld [vmem:[#allocation2 + $0x171] sm:$0xff]  ;;  %v442_v19 = vld [vmem:[#allocation2 + $0x60] sm:$0xff] }
  0x33   : > { %v7957_v7 = vpack.c.bf16 %v514_v3, %v513_v2  ;;  %v7981_v23 = vpack.c.bf16 %v443_v20, %v442_v19  ;;  %v444_v24 = vld [vmem:[#allocation2 + $0x78] sm:$0xff]  ;;  %v445_v25 = vld [vmem:[#allocation2 + $0x80] sm:$0xff]  ;;  %v448_v31 = vld [vmem:[#allocation2 + $0xa8] sm:$0xff] }
  0x34   : > { %6604 = vmatmul.mubr.msk.bf16.gmra.mrb[8].mxu0 %vm334_vm1, %v7917_v40  ;;  %v447_v28 = vld [vmem:[#allocation2 + $0x98] sm:$0xff]  ;;  %v7987_v29 = vpack.c.bf16 %v445_v25, %v444_v24  ;;  %v449_v32 = vld [vmem:[#allocation2 + $0xb0] sm:$0xff]  ;;  %v450_v33 = vld [vmem:[#allocation2 + $0xc0] sm:$0xff]  ;;  %v1352_v25 = vsel %vm581_vm0, %v7971_v16, 0 }
  0x35   : > { %6607 = vmatprep.mubr.msk.bf16.mxu0 %vm334_vm1, %v7919_v41  ;;  %v7989_v30 = vpack.c.bf16 %v447_v28, %v446_v27  ;;  %v451_v34 = vld [vmem:[#allocation2 + $0xc8] sm:$0xff]  ;;  %v7995_v6 = vpack.c.bf16 %v449_v32, %v448_v31  ;;  %v452_v38 = vld [vmem:[#allocation2 + $0xd8] sm:$0xff]  ;;  %v453_v39 = vld [vmem:[#allocation2 + $0xe0] sm:$0xff] }
  0x36   : > { %v7997_v37 = vpack.c.bf16 %v451_v34, %v450_v33  ;;  %v454_v42 = vld [vmem:[#allocation2 + $0xf0] sm:$0xff]  ;;  %v455_v43 = vld [vmem:[#allocation2 + $0xf8] sm:$0xff]  ;;  %v8003_v44 = vpack.c.bf16 %v453_v39, %v452_v38  ;;  %v456_v48 = vld [vmem:[#allocation2 + $0x108] sm:$0xff] }
  0x37   : > { %v8005_v45 = vpack.c.bf16 %v455_v43, %v454_v42  ;;  %v457_v49 = vld [vmem:[#allocation2 + $0x110] sm:$0xff]  ;;  %v458_v50 = vld [vmem:[#allocation2 + $0x120] sm:$0xff]  ;;  %v459_v51 = vld [vmem:[#allocation2 + $0x128] sm:$0xff] }
  0x38   : > { %v8011_v54 = vpack.c.bf16 %v457_v49, %v456_v48  ;;  %v8013_v55 = vpack.c.bf16 %v459_v51, %v458_v50  ;;  %v460_v56 = vld [vmem:[#allocation2 + $0x138] sm:$0xff]  ;;  %v461_v57 = vld [vmem:[#allocation2 + $0x140] sm:$0xff]  ;;  %v462_v60 = vld [vmem:[#allocation2 + $0x150] sm:$0xff] }
  0x39   : > { %v463_v61 = vld [vmem:[#allocation2 + $0x158] sm:$0xff]  ;;  %v6286_v62 = vld [vmem:[%s7807_s27 + $0xc0] sm:$0xff]   ;;  %v8020_v63 = vpack.c.bf16 %v461_v57, %v460_v56  ;;  %v464_v5 = vld [vmem:[#allocation2 + $0x168] sm:$0xff] }
  0x3a   : > { %v6277_v2 = vunpack.c.l.bf16 %v6286_v62  ;;  %v6278_v3 = vunpack.c.h.bf16 %v6286_v62  ;;  %v8022_v4 = vpack.c.bf16 %v463_v61, %v462_v60  ;;  %v958_v9 = vld [vmem:[#allocation2 + $0x2] sm:$0xff]  ;;  %v959_v10 = vld [vmem:[#allocation2 + $0xa] sm:$0xff]  ;;  %v962_v18 = vld [vmem:[#allocation2 + $0x32] sm:$0xff] }
  0x3b   : > { %v990_v12 = vpack.c.bf16 %v959_v10, %v958_v9  ;;  %v961_v17 = vld [vmem:[#allocation2 + $0x22] sm:$0xff]  ;;  %v963_v19 = vld [vmem:[#allocation2 + $0x3a] sm:$0xff]  ;;  %v964_v28 = vld [vmem:[#allocation2 + $0x4a] sm:$0xff] }
  0x3c   : > { %6608 = vmatmul.mubr.msk.bf16.gmra.mrb[12].mxu0 %vm334_vm1, %v7925_v46  ;;  %384 = vst.msk [vmem:[#allocation2 + $0x180] sm:$0xff] %vm334_vm1, %v6277_v2  ;;  %385 = vst.msk [vmem:[#allocation2 + $0x188] sm:$0xff] %vm334_vm1, %v6278_v3  ;;  %v8037_v24 = vpack.c.bf16 %v963_v19, %v962_v18  ;;  %v6001_v27 = vld [vmem:[%s8962_s1 + $0x8] sm:$0x3]  ;;  %v965_v31 = vld [vmem:[#allocation2 + $0x52] sm:$0xff] }
  0x3d   : > { %6611 = vmatprep.mubr.msk.bf16.mxu0 %vm334_vm1, %v7927_v47  ;;  %v966_v32 = vld [vmem:[#allocation2 + $0x62] sm:$0xff]  ;;  %v967_v33 = vld [vmem:[#allocation2 + $0x6a] sm:$0xff]  ;;  %v8049_v34 = vpack.c.bf16 %v965_v31, %v964_v28  ;;  %v968_v38 = vld [vmem:[#allocation2 + $0x7a] sm:$0xff] }
  0x3e   : > { %v969_v39 = vld [vmem:[#allocation2 + $0x82] sm:$0xff]  ;;  %v970_v42 = vld [vmem:[#allocation2 + $0x92] sm:$0xff]  ;;  %v971_v43 = vld [vmem:[#allocation2 + $0x9a] sm:$0xff] }
  0x3f   : > { %v8057_v48 = vpack.c.bf16 %v969_v39, %v968_v38  ;;  %v8059_v49 = vpack.c.bf16 %v971_v43, %v970_v42  ;;  %v972_v50 = vld [vmem:[#allocation2 + $0xaa] sm:$0xff]  ;;  %v973_v51 = vld [vmem:[#allocation2 + $0xb2] sm:$0xff]  ;;  %v974_v56 = vld [vmem:[#allocation2 + $0xc2] sm:$0xff] }
  0x40   : > { %v975_v57 = vld [vmem:[#allocation2 + $0xca] sm:$0xff]  ;;  %v8065_v60 = vpack.c.bf16 %v973_v51, %v972_v50  ;;  %v976_v62 = vld [vmem:[#allocation2 + $0xda] sm:$0xff]  ;;  %v977_v2 = vld [vmem:[#allocation2 + $0xe2] sm:$0xff] }
  0x41   : > { %v8067_v61 = vpack.c.bf16 %v975_v57, %v974_v56  ;;  %v978_v3 = vld [vmem:[#allocation2 + $0xf2] sm:$0xff]  ;;  %v980_v10 = vld [vmem:[#allocation2 + $0x10a] sm:$0xff]  ;;  %v985_v28 = vld [vmem:[#allocation2 + $0x142] sm:$0xff]  ;;  %v1646_v56 = vsel %vm581_vm0, %v6001_v27, 0 }
  0x42   : > { %v986_v31 = vld [vmem:[#allocation2 + $0x152] sm:$0xff]  ;;  %v988_v43 = vld [vmem:[#allocation2 + $0x16a] sm:$0xff] }
  0x43   : > { %v989_v50 = vld [vmem:[#allocation2 + $0x172] sm:$0xff]  ;;  %v6018_v57 = vld [vmem:[%s8962_s1 + $0xa] sm:$0x3] }
  0x44   : > { %6612 = vmatmul.mubr.msk.bf16.gmra.mrb[16].mxu0 %vm334_vm1, %v7933_v52  ;;  %v8099_v51 = vpack.c.bf16 %v989_v50, %v988_v43  ;;  %v2443_v43 = vld [vmem:[#allocation2 + $0xc9] sm:$0xff] }
  0x45   : > { %6615 = vmatprep.mubr.msk.bf16.mxu0 %vm334_vm1, %v7935_v53 }
  0x4c   : > { %6616 = vmatmul.mubr.msk.bf16.gmra.mrb[20].mxu0 %vm334_vm1, %v7941_v58 }
  0x4d   : > { %6619 = vmatprep.mubr.msk.bf16.mxu0 %vm334_vm1, %v7943_v59 }
  0x54   : > { %6620 = vmatmul.mubr.msk.bf16.gmra.mrb[24].mxu0 %vm334_vm1, %v7949_v0 }
  0x55   : > { %6623 = vmatprep.mubr.msk.bf16.mxu0 %vm334_vm1, %v7951_v1 }
  0x5c   : > { %6624 = vmatmul.mubr.msk.bf16.gmra.mrb[28].mxu0 %vm334_vm1, %v7957_v7 }
  0x5d   : > { %6629 = vmatprep.mubr.msk.bf16.mxu0 %vm334_vm1, %v466_v8  ;;  %v465_v8 = vld [vmem:[#allocation2 + $0x170] sm:$0xff] }
  0x5e   : > { %v8030_v11 = vpack.c.bf16 %v465_v8, %v464_v5  ;;  %v979_v5 = vld [vmem:[#allocation2 + $0xfa] sm:$0xff]  ;;  %v8073_v8 = vpack.c.bf16 %v977_v2, %v976_v62  ;;  %v1940_v2 = vsel %vm581_vm0, %v6018_v57, 0 }
  0x5f   : > { %v8075_v9 = vpack.c.bf16 %v979_v5, %v978_v3  ;;  %v6035_v3 = vld [vmem:[%s8962_s1 + $0xc] sm:$0x3] }
  0x64   : > { %6630 = vmatmul.mubr.msk.bf16.vlgmr.msra.gmra.mrb[0].mxu0 %vm334_vm1, %v7962_v13 }
  0x65   : > { %6662 = vmatpush3.bf16.msra.mxu0 %v1057_v15  ;;  %6633 = vmatprep.mubr.msk.bf16.mxu0 %vm334_vm1, %v7964_v14  ;;  %v960_v15 = vld [vmem:[#allocation2 + $0x1a] sm:$0xff] }
  0x66   : > { %7720 = vmatprep.subr.msk.bf16.mxu0 %vm581_vm0, %v7971_v16  ;;  %v8035_v20 = vpack.c.bf16 %v961_v17, %v960_v15  ;;  %v8051_v16 = vpack.c.bf16 %v967_v33, %v966_v32  ;;  %v982_v15 = vld [vmem:[#allocation2 + $0x122] sm:$0xff]  ;;  %v983_v17 = vld [vmem:[#allocation2 + $0x12a] sm:$0xff]  ;;  %v987_v32 = vld [vmem:[#allocation2 + $0x15a] sm:$0xff] }
  0x67   : > { %v8083_v19 = vpack.c.bf16 %v983_v17, %v982_v15  ;;  %v276_v33 = vld [vmem:[%s7807_s27 + $0xc8] sm:$0x1]  ;;  %v8092_v42 = vpack.c.bf16 %v987_v32, %v986_v31  ;;  %v2438_v17 = vld [vmem:[#allocation2 + $0x91] sm:$0xff]  ;;  %v2440_v32 = vld [vmem:[#allocation2 + $0xa9] sm:$0xff] }
  0x68   : > { %v330_v39 = vunpack.c.l.bf16 %v276_v33  ;;  %v2437_v15 = vld [vmem:[#allocation2 + $0x81] sm:$0xff]  ;;  %v2441_v33 = vld [vmem:[#allocation2 + $0xb1] sm:$0xff] }
  0x69   : > { %v2467_v50 = vpack.c.bf16 %v2441_v33, %v2440_v32 }
  0x6a   : > { %386 = vst.msk [vmem:[#allocation2 + $0x190] sm:$0x3] %vm337_vm2, %v330_v39  ;;  %v2442_v39 = vld [vmem:[#allocation2 + $0xc1] sm:$0xff] }
  0x6c   : > { %6634 = vmatmul.mubr.msk.bf16.gmra.mrb[4].mxu0 %vm334_vm1, %v7979_v22 }
  0x6d   : > { %6637 = vmatprep.mubr.msk.bf16.mxu0 %vm334_vm1, %v7981_v23 }
  0x74   : > { %6638 = vmatmul.mubr.msk.bf16.gmra.mrb[8].mxu0 %vm334_vm1, %v7987_v29 }
  0x75   : > { %6641 = vmatprep.mubr.msk.bf16.mxu0 %vm334_vm1, %v7989_v30 }
  0x7c   : > { %6642 = vmatmul.mubr.msk.bf16.gmra.mrb[12].mxu0 %vm334_vm1, %v7995_v6 }
  0x7d   : > { %6645 = vmatprep.mubr.msk.bf16.mxu0 %vm334_vm1, %v7997_v37 }
  0x84   : > { %6646 = vmatmul.mubr.msk.bf16.gmra.mrb[16].mxu0 %vm334_vm1, %v8003_v44 }
  0x85   : > { %6649 = vmatprep.mubr.msk.bf16.mxu0 %vm334_vm1, %v8005_v45 }
  0x8c   : > { %6650 = vmatmul.mubr.msk.bf16.gmra.mrb[20].mxu0 %vm334_vm1, %v8011_v54 }
  0x8d   : > { %6653 = vmatprep.mubr.msk.bf16.mxu0 %vm334_vm1, %v8013_v55 }
  0x94   : > { %6654 = vmatmul.mubr.msk.bf16.gmra.mrb[24].mxu0 %vm334_vm1, %v8020_v63 }
  0x95   : > { %6657 = vmatprep.mubr.msk.bf16.mxu0 %vm334_vm1, %v8022_v4 }
  0x9c   : > { %6658 = vmatmul.mubr.msk.bf16.gmra.mrb[28].mxu0 %vm334_vm1, %v8030_v11 }
  0x9d   : > { %6663 = vmatprep.mubr.msk.bf16.mxu0 %vm334_vm1, %v990_v12  ;;  %v981_v12 = vld [vmem:[#allocation2 + $0x112] sm:$0xff] }
  0x9e   : > { %v8081_v18 = vpack.c.bf16 %v981_v12, %v980_v10  ;;  %v6069_v12 = vld [vmem:[%s8962_s1 + $0x10] sm:$0x3] }
  0xa4   : > { %6664 = vmatmul.mubr.msk.bf16.vlgmr.msra.gmra.mrb[0].mxu0 %vm334_vm1, %v8035_v20 }
  0xa5   : > { %6696 = vmatpush3.bf16.msra.mxu0 %v1352_v25  ;;  %6667 = vmatprep.mubr.msk.bf16.mxu0 %vm334_vm1, %v8037_v24  ;;  %v984_v25 = vld [vmem:[#allocation2 + $0x13a] sm:$0xff] }
  0xa6   : > { %7721 = vmatprep.subr.msk.bf16.mxu0 %vm581_vm0, %v6001_v27  ;;  %v8090_v38 = vpack.c.bf16 %v985_v28, %v984_v25  ;;  %v1284_v27 = vld [vmem:[#allocation2 + $0x188] sm:$0xff]  ;;  %v2439_v25 = vld [vmem:[#allocation2 + $0x99] sm:$0xff] }
  0xa7   : > { %v2466_v31 = vpack.c.bf16 %v2439_v25, %v2438_v17 }
  0xac   : > { %6668 = vmatmul.mubr.msk.bf16.gmra.mrb[4].mxu0 %vm334_vm1, %v8049_v34 }
  0xad   : > { %6671 = vmatprep.mubr.msk.bf16.mxu0 %vm334_vm1, %v8051_v16 }
  0xb4   : > { %6672 = vmatmul.mubr.msk.bf16.gmra.mrb[8].mxu0 %vm334_vm1, %v8057_v48 }
  0xb5   : > { %6675 = vmatprep.mubr.msk.bf16.mxu0 %vm334_vm1, %v8059_v49 }
  0xbc   : > { %6676 = vmatmul.mubr.msk.bf16.gmra.mrb[12].mxu0 %vm334_vm1, %v8065_v60 }
  0xbd   : > { %6679 = vmatprep.mubr.msk.bf16.mxu0 %vm334_vm1, %v8067_v61 }
  0xc4   : > { %6680 = vmatmul.mubr.msk.bf16.gmra.mrb[16].mxu0 %vm334_vm1, %v8073_v8 }
  0xc5   : > { %6683 = vmatprep.mubr.msk.bf16.mxu0 %vm334_vm1, %v8075_v9 }
  0xcc   : > { %6684 = vmatmul.mubr.msk.bf16.gmra.mrb[20].mxu0 %vm334_vm1, %v8081_v18 }
  0xcd   : > { %6687 = vmatprep.mubr.msk.bf16.mxu0 %vm334_vm1, %v8083_v19 }
  0xd4   : > { %6688 = vmatmul.mubr.msk.bf16.gmra.mrb[24].mxu0 %vm334_vm1, %v8090_v38 }
  0xd5   : > { %6691 = vmatprep.mubr.msk.bf16.mxu0 %vm334_vm1, %v8092_v42 }
  0xdc   : > { %6692 = vmatmul.mubr.msk.bf16.gmra.mrb[28].mxu0 %vm334_vm1, %v8099_v51 }
  0xdd   : > { %6697 = vmatprep.mubr.msk.bf16.mxu0 %vm334_vm1, %v7962_v13  ;;  %v1283_v13 = vld [vmem:[#allocation2 + $0x180] sm:$0xff] }
  0xde   : > { %v8138_v62 = vpack.c.bf16 %v1284_v27, %v1283_v13  ;;  %v2445_v13 = vld [vmem:[#allocation2 + $0xe1] sm:$0xff]  ;;  %v2446_v27 = vld [vmem:[#allocation2 + $0xf1] sm:$0xff] }
  0xe4   : > { %6698 = vmatmul.mubr.msk.bf16.vlgmr.msra.gmra.mrb[0].mxu0 %vm334_vm1, %v7964_v14 }
  0xe5   : > { %6730 = vmatpush3.bf16.msra.mxu0 %v1646_v56  ;;  %6701 = vmatprep.mubr.msk.bf16.mxu0 %vm334_vm1, %v7979_v22  ;;  %v2468_v56 = vpack.c.bf16 %v2443_v43, %v2442_v39 }
  0xe6   : > { %7722 = vmatprep.subr.msk.bf16.mxu0 %vm581_vm0, %v6018_v57  ;;  %v2444_v57 = vld [vmem:[#allocation2 + $0xd9] sm:$0xff] }
  0xec   : > { %6702 = vmatmul.mubr.msk.bf16.gmra.mrb[4].mxu0 %vm334_vm1, %v7981_v23 }
  0xed   : > { %6705 = vmatprep.mubr.msk.bf16.mxu0 %vm334_vm1, %v7987_v29 }
  0xf4   : > { %6706 = vmatmul.mubr.msk.bf16.gmra.mrb[8].mxu0 %vm334_vm1, %v7989_v30 }
  0xf5   : > { %6709 = vmatprep.mubr.msk.bf16.mxu0 %vm334_vm1, %v7995_v6 }
  0xfc   : > { %6710 = vmatmul.mubr.msk.bf16.gmra.mrb[12].mxu0 %vm334_vm1, %v7997_v37 }
  0xfd   : > { %6713 = vmatprep.mubr.msk.bf16.mxu0 %vm334_vm1, %v8003_v44 }
 0x104   : > { %6714 = vmatmul.mubr.msk.bf16.gmra.mrb[16].mxu0 %vm334_vm1, %v8005_v45 }
 0x105   : > { %6717 = vmatprep.mubr.msk.bf16.mxu0 %vm334_vm1, %v8011_v54 }
 0x10c   : > { %6718 = vmatmul.mubr.msk.bf16.gmra.mrb[20].mxu0 %vm334_vm1, %v8013_v55 }
 0x10d   : > { %6721 = vmatprep.mubr.msk.bf16.mxu0 %vm334_vm1, %v8020_v63 }
 0x114   : > { %6722 = vmatmul.mubr.msk.bf16.gmra.mrb[24].mxu0 %vm334_vm1, %v8022_v4 }
 0x115   : > { %6725 = vmatprep.mubr.msk.bf16.mxu0 %vm334_vm1, %v8030_v11 }
 0x11c   : > { %6726 = vmatmul.mubr.msk.bf16.gmra.mrb[28].mxu0 %vm334_vm1, %v8138_v62 }
 0x11d   : > { %6731 = vmatprep.mubr.msk.bf16.mxu0 %vm334_vm1, %v7879_v21  ;;  %v277_v21 = vld [vmem:[%s7807_s27 + $0xcc] sm:$0xff]  }
 0x124   : > { %6732 = vmatmul.mubr.msk.bf16.vlgmr.msra.gmra.mrb[0].mxu0 %vm334_vm1, %v7886_v26  ;;  %v331_v26 = vunpack.c.l.bf16 %v277_v21 }
 0x125   : > { %6764 = vmatpush3.bf16.msra.mxu0 %v1940_v2  ;;  %6735 = vmatprep.mubr.msk.bf16.mxu0 %vm334_vm1, %v7909_v35  ;;  %v332_v35 = vunpack.c.h.bf16 %v277_v21  ;;  %v2469_v2 = vpack.c.bf16 %v2445_v13, %v2444_v57  ;;  %v2448_v21 = vld [vmem:[#allocation2 + $0x109] sm:$0xff] }
 0x126   : > { %7723 = vmatprep.subr.msk.bf16.mxu0 %vm581_vm0, %v6035_v3  ;;  %387 = vst.msk [vmem:[#allocation2 + $0x198] sm:$0xff] %vm334_vm1, %v331_v26  ;;  %v2449_v26 = vld [vmem:[#allocation2 + $0x111] sm:$0xff] }
 0x127   : > { %388 = vst.msk [vmem:[#allocation2 + $0x1a0] sm:$0xff] %vm334_vm1, %v332_v35  ;;  %v2471_v35 = vpack.c.bf16 %v2449_v26, %v2448_v21 }
 0x12c   : > { %6736 = vmatmul.mubr.msk.bf16.gmra.mrb[4].mxu0 %vm334_vm1, %v7911_v36  ;;  %v1577_v36 = vld [vmem:[#allocation2 + $0x181] sm:$0xff] }
 0x12d   : > { %6739 = vmatprep.mubr.msk.bf16.mxu0 %vm334_vm1, %v7917_v40  ;;  %v1578_v40 = vld [vmem:[#allocation2 + $0x189] sm:$0xff] }
 0x134   : > { %6740 = vmatmul.mubr.msk.bf16.gmra.mrb[8].mxu0 %vm334_vm1, %v7919_v41  ;;  %v8180_v41 = vpack.c.bf16 %v1578_v40, %v1577_v36  ;;  %v2460_v36 = vld [vmem:[#allocation2 + $0x199] sm:$0xff] }
 0x135   : > { %6743 = vmatprep.mubr.msk.bf16.mxu0 %vm334_vm1, %v7925_v46  ;;  %v2235_v46 = vsel %vm581_vm0, %v6035_v3, 0 }
 0x13c   : > { %6744 = vmatmul.mubr.msk.bf16.gmra.mrb[12].mxu0 %vm334_vm1, %v7927_v47  ;;  %v6052_v47 = vld [vmem:[%s8962_s1 + $0xe] sm:$0x3] }
 0x13d   : > { %6747 = vmatprep.mubr.msk.bf16.mxu0 %vm334_vm1, %v7933_v52  ;;  %v279_v52 = vld [vmem:[%s7807_s27 + $0xd4] sm:$0x1]  ;;  %v2529_v10 = vsel %vm581_vm0, %v6052_v47, 0 }
 0x144   : > { %6748 = vmatmul.mubr.msk.bf16.gmra.mrb[16].mxu0 %vm334_vm1, %v7935_v53  ;;  %v333_v53 = vunpack.c.l.bf16 %v279_v52 }
 0x145   : > { %6751 = vmatprep.mubr.msk.bf16.mxu0 %vm334_vm1, %v7941_v58  ;;  %v1871_v58 = vld [vmem:[#allocation2 + $0x182] sm:$0xff] }
 0x146   : > { %389 = vst.msk [vmem:[#allocation2 + $0x1a8] sm:$0x3] %vm337_vm2, %v333_v53 }
 0x14c   : > { %6752 = vmatmul.mubr.msk.bf16.gmra.mrb[20].mxu0 %vm334_vm1, %v7943_v59 }
 0x14d   : > { %6755 = vmatprep.mubr.msk.bf16.mxu0 %vm334_vm1, %v7949_v0  ;;  %v2461_v40 = vld [vmem:[#allocation2 + $0x1a1] sm:$0xff] }
 0x154   : > { %6756 = vmatmul.mubr.msk.bf16.gmra.mrb[24].mxu0 %vm334_vm1, %v7951_v1 }
 0x155   : > { %6759 = vmatprep.mubr.msk.bf16.mxu0 %vm334_vm1, %v7957_v7 }
 0x15c   : > { %6760 = vmatmul.mubr.msk.bf16.gmra.mrb[28].mxu0 %vm334_vm1, %v8180_v41 }
 0x15d   : > { %6765 = vmatprep.mubr.msk.bf16.mxu0 %vm334_vm1, %v8035_v20  ;;  %v1872_v20 = vld [vmem:[#allocation2 + $0x18a] sm:$0xff] }
 0x15e   : > { %v8221_v5 = vpack.c.bf16 %v1872_v20, %v1871_v58 }
 0x164   : > { %6766 = vmatmul.mubr.msk.bf16.vlgmr.msra.gmra.mrb[0].mxu0 %vm334_vm1, %v8037_v24 }
 0x165   : > { %6798 = vmatpush3.bf16.msra.mxu0 %v2235_v46  ;;  %6769 = vmatprep.mubr.msk.bf16.mxu0 %vm334_vm1, %v8049_v34  ;;  %v2477_v46 = vpack.c.bf16 %v2461_v40, %v2460_v36 }
 0x166   : > { %7724 = vmatprep.subr.msk.bf16.mxu0 %vm581_vm0, %v6052_v47 }
 0x16c   : > { %6770 = vmatmul.mubr.msk.bf16.gmra.mrb[4].mxu0 %vm334_vm1, %v8051_v16 }
 0x16d   : > { %6773 = vmatprep.mubr.msk.bf16.mxu0 %vm334_vm1, %v8057_v48 }
 0x174   : > { %6774 = vmatmul.mubr.msk.bf16.gmra.mrb[8].mxu0 %vm334_vm1, %v8059_v49 }
 0x175   : > { %6777 = vmatprep.mubr.msk.bf16.mxu0 %vm334_vm1, %v8065_v60 }
 0x17c   : > { %6778 = vmatmul.mubr.msk.bf16.gmra.mrb[12].mxu0 %vm334_vm1, %v8067_v61 }
 0x17d   : > { %6781 = vmatprep.mubr.msk.bf16.mxu0 %vm334_vm1, %v8073_v8 }
 0x184   : > { %6782 = vmatmul.mubr.msk.bf16.gmra.mrb[16].mxu0 %vm334_vm1, %v8075_v9 }
 0x185   : > { %6785 = vmatprep.mubr.msk.bf16.mxu0 %vm334_vm1, %v8081_v18 }
 0x18c   : > { %6786 = vmatmul.mubr.msk.bf16.gmra.mrb[20].mxu0 %vm334_vm1, %v8083_v19 }
 0x18d   : > { %6789 = vmatprep.mubr.msk.bf16.mxu0 %vm334_vm1, %v8090_v38 }
 0x194   : > { %6790 = vmatmul.mubr.msk.bf16.gmra.mrb[24].mxu0 %vm334_vm1, %v8092_v42 }
 0x195   : > { %6793 = vmatprep.mubr.msk.bf16.mxu0 %vm334_vm1, %v8099_v51 }
 0x19c   : > { %6794 = vmatmul.mubr.msk.bf16.gmra.mrb[28].mxu0 %vm334_vm1, %v8221_v5 }
 0x19d   : > { %6799 = vmatprep.mubr.msk.bf16.mxu0 %vm334_vm1, %v7964_v14  ;;  %v2166_v14 = vld [vmem:[#allocation2 + $0x198] sm:$0xff] }
 0x1a4   : > { %6800 = vmatmul.mubr.msk.bf16.vlgmr.msra.gmra.mrb[0].mxu0 %vm334_vm1, %v7979_v22  ;;  %v2167_v22 = vld [vmem:[#allocation2 + $0x1a0] sm:$0xff] }
 0x1a5   : > { %6832 = vmatpush3.bf16.msra.mxu0 %v2529_v10  ;;  %6803 = vmatprep.mubr.msk.bf16.mxu0 %vm334_vm1, %v7981_v23  ;;  %v2430_v23 = vld [vmem:[#allocation2 + $0x31] sm:$0xff] }
 0x1a6   : > { %7725 = vmatprep.subr.msk.bf16.mxu0 %vm581_vm0, %v6069_v12 }
 0x1ac   : > { %6804 = vmatmul.mubr.msk.bf16.gmra.mrb[4].mxu0 %vm334_vm1, %v7987_v29  ;;  %v2431_v29 = vld [vmem:[#allocation2 + $0x39] sm:$0xff] }
 0x1ad   : > { %6807 = vmatprep.mubr.msk.bf16.mxu0 %vm334_vm1, %v7989_v30  ;;  %v2183_v30 = vpack.c.bf16 %v2167_v22, %v2166_v14 }
 0x1b4   : > { %6808 = vmatmul.mubr.msk.bf16.gmra.mrb[8].mxu0 %vm334_vm1, %v7995_v6  ;;  %v2462_v6 = vpack.c.bf16 %v2431_v29, %v2430_v23 }
 0x1b5   : > { %6811 = vmatprep.mubr.msk.bf16.mxu0 %vm334_vm1, %v7997_v37  ;;  %v2432_v37 = vld [vmem:[#allocation2 + $0x49] sm:$0xff] }
 0x1bc   : > { %6812 = vmatmul.mubr.msk.bf16.gmra.mrb[12].mxu0 %vm334_vm1, %v8003_v44  ;;  %v2433_v44 = vld [vmem:[#allocation2 + $0x51] sm:$0xff] }
 0x1bd   : > { %6815 = vmatprep.mubr.msk.bf16.mxu0 %vm334_vm1, %v8005_v45  ;;  %v2434_v45 = vld [vmem:[#allocation2 + $0x61] sm:$0xff] }
 0x1c4   : > { %6816 = vmatmul.mubr.msk.bf16.gmra.mrb[16].mxu0 %vm334_vm1, %v8011_v54  ;;  %v2435_v54 = vld [vmem:[#allocation2 + $0x69] sm:$0xff] }
 0x1c5   : > { %6819 = vmatprep.mubr.msk.bf16.mxu0 %vm334_vm1, %v8013_v55  ;;  %v2463_v55 = vpack.c.bf16 %v2433_v44, %v2432_v37 }
 0x1cc   : > { %6820 = vmatmul.mubr.msk.bf16.gmra.mrb[20].mxu0 %vm334_vm1, %v8020_v63  ;;  %v2464_v63 = vpack.c.bf16 %v2435_v54, %v2434_v45 }
 0x1cd   : > { %6823 = vmatprep.mubr.msk.bf16.mxu0 %vm334_vm1, %v8022_v4  ;;  %v2823_v4 = vsel %vm581_vm0, %v6069_v12, 0 }
 0x1d4   : > { %6824 = vmatmul.mubr.msk.bf16.gmra.mrb[24].mxu0 %vm334_vm1, %v8030_v11  ;;  %v2436_v11 = vld [vmem:[#allocation2 + $0x79] sm:$0xff] }
 0x1d5   : > { %6827 = vmatprep.mubr.msk.bf16.mxu0 %vm334_vm1, %v8138_v62  ;;  %v2465_v28 = vpack.c.bf16 %v2437_v15, %v2436_v11  ;;  %v2447_v62 = vld [vmem:[#allocation2 + $0xf9] sm:$0xff] }
 0x1d6   : > { %v2470_v3 = vpack.c.bf16 %v2447_v62, %v2446_v27 }
 0x1dc   : > { %6828 = vmatmul.mubr.msk.bf16.gmra.mrb[28].mxu0 %vm334_vm1, %v2183_v30 }
 0x1dd   : > { %6833 = vmatprep.mubr.msk.bf16.mxu0 %vm334_vm1, %v2462_v6 }
 0x1e4   : > { %6834 = vmatmul.mubr.msk.bf16.vlgmr.msra.gmra.mrb[0].mxu0 %vm334_vm1, %v2463_v55 }
 0x1e5   : > { %6866 = vmatpush3.bf16.msra.mxu0 %v2823_v4  ;;  %6837 = vmatprep.mubr.msk.bf16.mxu0 %vm334_vm1, %v2464_v63 }
 0x1ec   : > { %6838 = vmatmul.mubr.msk.bf16.gmra.mrb[4].mxu0 %vm334_vm1, %v2465_v28 }
 0x1ed   : > { %6841 = vmatprep.mubr.msk.bf16.mxu0 %vm334_vm1, %v2466_v31  ;;  %v8396_v31 = vld [vmem:[%s8964_s3 + $0x4] sm:$0x3] }
 0x1f4   : > { %6842 = vmatmul.mubr.msk.bf16.gmra.mrb[8].mxu0 %vm334_vm1, %v2467_v50 }
 0x1f5   : > { %6845 = vmatprep.mubr.msk.bf16.mxu0 %vm334_vm1, %v2468_v56 }
 0x1fc   : > { %6846 = vmatmul.mubr.msk.bf16.gmra.mrb[12].mxu0 %vm334_vm1, %v2469_v2 }
 0x1fd   : > { %6849 = vmatprep.mubr.msk.bf16.mxu0 %vm334_vm1, %v2470_v3 }
 0x204   : > { %6850 = vmatmul.mubr.msk.bf16.gmra.mrb[16].mxu0 %vm334_vm1, %v2471_v35 }
 0x205   : > { %6853 = vmatprep.mubr.msk.bf16.mxu0 %vm334_vm1, %v7943_v59  ;;  %v2754_v59 = vld [vmem:[#allocation2 + $0x19a] sm:$0xff] }
 0x20c   : > { %6854 = vmatmul.mubr.msk.bf16.gmra.mrb[20].mxu0 %vm334_vm1, %v7949_v0  ;;  %v2755_v0 = vld [vmem:[#allocation2 + $0x1a2] sm:$0xff] }
 0x20d   : > { %6857 = vmatprep.mubr.msk.bf16.mxu0 %vm334_vm1, %v7951_v1  ;;  %v2771_v1 = vpack.c.bf16 %v2755_v0, %v2754_v59 }
 0x214   : > { %6858 = vmatmul.mubr.msk.bf16.gmra.mrb[24].mxu0 %vm334_vm1, %v7957_v7  ;;  %v7753_v7 = vmov 0.0  }
 0x215   : > { %6861 = vmatprep.mubr.msk.bf16.mxu0 %vm334_vm1, %v8180_v41  ;;  %390 = vst.msk [vmem:[#allocation3] sm:$0xff] %vm334_vm1, %v7753_v7  ;;  %391 = vst.msk [vmem:[#allocation3 + $0x8] sm:$0xff] %vm334_vm1, %v7753_v7 }
 0x216   : > { %392 = vst.msk [vmem:[#allocation3 + $0x10] sm:$0x3] %vm337_vm2, %v7753_v7  ;;  %396 = vst.msk [vmem:[#allocation3 + $0x1a8] sm:$0x3] %vm337_vm2, %v7753_v7 }
 0x217   : > { %394 = vst.msk [vmem:[#allocation3 + $0x198] sm:$0xff] %vm334_vm1, %v7753_v7  ;;  %395 = vst.msk [vmem:[#allocation3 + $0x1a0] sm:$0xff] %vm334_vm1, %v7753_v7 }
 0x218   : > { %399 = vst.msk [vmem:[#allocation3 + $0x18] sm:$0x1] %vm397_vm3, %v7753_v7  ;;  %400 = vst.msk [vmem:[#allocation3 + $0x30] sm:$0x1] %vm397_vm3, %v7753_v7 }
 0x219   : > { %401 = vst.msk [vmem:[#allocation3 + $0x48] sm:$0x1] %vm397_vm3, %v7753_v7  ;;  %402 = vst.msk [vmem:[#allocation3 + $0x60] sm:$0x1] %vm397_vm3, %v7753_v7 }
 0x21a   : > { %403 = vst.msk [vmem:[#allocation3 + $0x78] sm:$0x1] %vm397_vm3, %v7753_v7  ;;  %404 = vst.msk [vmem:[#allocation3 + $0x90] sm:$0x1] %vm397_vm3, %v7753_v7 }
 0x21b   : > { %405 = vst.msk [vmem:[#allocation3 + $0xa8] sm:$0x1] %vm397_vm3, %v7753_v7  ;;  %406 = vst.msk [vmem:[#allocation3 + $0xc0] sm:$0x1] %vm397_vm3, %v7753_v7 }
 0x21c   : > { %6862 = vmatmul.mubr.msk.bf16.gmra.mrb[28].mxu0 %vm334_vm1, %v2477_v46  ;;  %407 = vst.msk [vmem:[#allocation3 + $0xd8] sm:$0x1] %vm397_vm3, %v7753_v7  ;;  %408 = vst.msk [vmem:[#allocation3 + $0xf0] sm:$0x1] %vm397_vm3, %v7753_v7 }
 0x21d   : > { %6867 = vmatprep.mubr.msk.bf16.mxu0 %vm334_vm1, %v8037_v24  ;;  %409 = vst.msk [vmem:[#allocation3 + $0x108] sm:$0x1] %vm397_vm3, %v7753_v7  ;;  %410 = vst.msk [vmem:[#allocation3 + $0x120] sm:$0x1] %vm397_vm3, %v7753_v7  ;;  %v6087_v24 = vld [vmem:[%s8964_s3 + $0x2] sm:$0x3] }
 0x21e   : > { %411 = vst.msk [vmem:[#allocation3 + $0x138] sm:$0x1] %vm397_vm3, %v7753_v7  ;;  %412 = vst.msk [vmem:[#allocation3 + $0x150] sm:$0x1] %vm397_vm3, %v7753_v7  ;;  %7726 = vmatprep.subr.msk.bf16.mxu1 %vm581_vm0, %v6087_v24 }
 0x21f   : > { %413 = vst.msk [vmem:[#allocation3 + $0x168] sm:$0x1] %vm397_vm3, %v7753_v7  ;;  %414 = vst.msk [vmem:[#allocation3 + $0x180] sm:$0x1] %vm397_vm3, %v7753_v7 }
 0x220   : > { %417 = vst.msk [vmem:[#allocation3 + $0x29] sm:$0x1] %vm397_vm3, %v7753_v7  ;;  %418 = vst.msk [vmem:[#allocation3 + $0x41] sm:$0x1] %vm397_vm3, %v7753_v7 }
 0x221   : > { %419 = vst.msk [vmem:[#allocation3 + $0x59] sm:$0x1] %vm397_vm3, %v7753_v7  ;;  %420 = vst.msk [vmem:[#allocation3 + $0x71] sm:$0x1] %vm397_vm3, %v7753_v7 }
 0x222   : > { %421 = vst.msk [vmem:[#allocation3 + $0x89] sm:$0x1] %vm397_vm3, %v7753_v7  ;;  %422 = vst.msk [vmem:[#allocation3 + $0xa1] sm:$0x1] %vm397_vm3, %v7753_v7 }
 0x223   : > { %423 = vst.msk [vmem:[#allocation3 + $0xb9] sm:$0x1] %vm397_vm3, %v7753_v7  ;;  %424 = vst.msk [vmem:[#allocation3 + $0xd1] sm:$0x1] %vm397_vm3, %v7753_v7 }
 0x224   : > { %6868 = vmatmul.mubr.msk.bf16.vlgmr.msra.gmra.mrb[0].mxu0 %vm334_vm1, %v8049_v34  ;;  %425 = vst.msk [vmem:[#allocation3 + $0xe9] sm:$0x1] %vm397_vm3, %v7753_v7  ;;  %426 = vst.msk [vmem:[#allocation3 + $0x101] sm:$0x1] %vm397_vm3, %v7753_v7  ;;  %v3270_v34 = vsel %vm581_vm0, %v6087_v24, 0 }
 0x225   : > { %6871 = vmatprep.mubr.msk.bf16.mxu0 %vm334_vm1, %v8051_v16  ;;  %427 = vst.msk [vmem:[#allocation3 + $0x119] sm:$0x1] %vm397_vm3, %v7753_v7  ;;  %428 = vst.msk [vmem:[#allocation3 + $0x131] sm:$0x1] %vm397_vm3, %v7753_v7  ;;  %v3171_v16 = vld [vmem:[#allocation3 + $0x1] sm:$0xff]  ;;  %6900 = vmatpush3.bf16.msra.mxu1 %v3270_v34 }
 0x226   : > { %429 = vst.msk [vmem:[#allocation3 + $0x149] sm:$0x1] %vm397_vm3, %v7753_v7  ;;  %430 = vst.msk [vmem:[#allocation3 + $0x161] sm:$0x1] %vm397_vm3, %v7753_v7 }
 0x227   : > { %431 = vst.msk [vmem:[#allocation3 + $0x179] sm:$0x1] %vm397_vm3, %v7753_v7  ;;  %432 = vst.msk [vmem:[#allocation3 + $0x191] sm:$0x1] %vm397_vm3, %v7753_v7 }
 0x228   : > { %398 = vst.msk [vmem:[#allocation3] sm:$0x1] %vm397_vm3, %v7753_v7  ;;  %416 = vst.msk [vmem:[#allocation3 + $0x11] sm:$0x1] %vm397_vm3, %v7753_v7 }
 0x229   : > { %415 = vst.msk [vmem:[#allocation3 + $0x198] sm:$0x1] %vm397_vm3, %v7753_v7  ;;  %433 = vst.msk [vmem:[#allocation3 + $0x1a9] sm:$0x1] %vm397_vm3, %v7753_v7 }
 0x22c   : > { %6872 = vmatmul.mubr.msk.bf16.gmra.mrb[4].mxu0 %vm334_vm1, %v8057_v48  ;;  %v3172_v48 = vld [vmem:[#allocation3 + $0x9] sm:$0xff] }
 0x22d   : > { %6875 = vmatprep.mubr.msk.bf16.mxu0 %vm334_vm1, %v8059_v49  ;;  %v3203_v49 = vpack.c.bf16 %v3172_v48, %v3171_v16 }
 0x22f   : > { %6901 = vmatprep.mubr.msk.bf16.mxu1 %vm334_vm1, %v3203_v49 }
 0x234   : > { %6876 = vmatmul.mubr.msk.bf16.gmra.mrb[8].mxu0 %vm334_vm1, %v8065_v60  ;;  %v3170_v60 = vld [vmem:[%s8964_s3] sm:$0x3] }
 0x235   : > { %6879 = vmatprep.mubr.msk.bf16.mxu0 %vm334_vm1, %v8067_v61  ;;  %7727 = vmatprep.subr.msk.bf16.mxu1 %vm581_vm0, %v3170_v60  ;;  %v8369_v61 = vld [vmem:[%s8963_s2] ss:$0 sm:$0xff]  ;;  %v3482_v11 = vsel %vm581_vm0, %v3170_v60, 0 }
 0x23c   : > { %6880 = vmatmul.mubr.msk.bf16.gmra.mrb[12].mxu0 %vm334_vm1, %v8073_v8 }
 0x23d   : > { %6883 = vmatprep.mubr.msk.bf16.mxu0 %vm334_vm1, %v8075_v9 }
 0x244   : > { %6884 = vmatmul.mubr.msk.bf16.gmra.mrb[16].mxu0 %vm334_vm1, %v8081_v18 }
 0x245   : > { %6887 = vmatprep.mubr.msk.bf16.mxu0 %vm334_vm1, %v8083_v19 }
 0x24c   : > { %6888 = vmatmul.mubr.msk.bf16.gmra.mrb[20].mxu0 %vm334_vm1, %v8090_v38 }
 0x24d   : > { %6891 = vmatprep.mubr.msk.bf16.mxu0 %vm334_vm1, %v8092_v42 }
 0x254   : > { %6892 = vmatmul.mubr.msk.bf16.gmra.mrb[24].mxu0 %vm334_vm1, %v8099_v51 }
 0x255   : > { %6895 = vmatprep.mubr.msk.bf16.mxu0 %vm334_vm1, %v8221_v5 }
 0x25c   : > { %6896 = vmatmul.mubr.msk.bf16.gmra.mrb[28].mxu0 %vm334_vm1, %v2771_v1 }
 0x2f7   : > { %v6869_v8 = vpop.f32.mrb[0].mxu0 }
 0x2f8   : > { %v3027_v9 = vadd.f32 %v6869_v8, %v8369_v61  ;;  %v2859_v18 = vpop.f32.mrb[1].mxu0 }
 0x2f9   : > { %v3025_v19 = vadd.f32 %v8369_v61, %v2859_v18  ;;  %v6870_v38 = vpop.f32.mrb[2].mxu0 }
 0x2fa   : > { %v3059_v42 = vmax.f32 %v3027_v9, 0.0  ;;  %v3028_v51 = vadd.f32 %v6870_v38, %v8369_v61  ;;  %v2862_v41 = vpop.f32.mrb[3].mxu0 }
 0x2fb   : > { %v3057_v47 = vmax.f32 %v3025_v19, 0.0  ;;  %v3026_v52 = vadd.f32 %v8369_v61, %v2862_v41 }
 0x2fc   : > { %3092 = vst.msk [vmem:[#allocation3 + $0x31] sm:$0xff] %vm334_vm1, %v3059_v42  ;;  %v3060_v53 = vmax.f32 %v3028_v51, 0.0 }
 0x2fd   : > { %3090 = vst.msk [vmem:[#allocation3 + $0x19] sm:$0xff] %vm334_vm1, %v3057_v47  ;;  %v3058_v58 = vmax.f32 %v3026_v52, 0.0 }
 0x2fe   : > { %3093 = vst.msk [vmem:[#allocation3 + $0x39] sm:$0xff] %vm334_vm1, %v3060_v53 }
 0x2ff   : > { %3091 = vst.msk [vmem:[#allocation3 + $0x21] sm:$0xff] %vm334_vm1, %v3058_v58  ;;  %v6873_v20 = vpop.f32.mrb[4].mxu0 }
 0x300   : > { %v3031_v5 = vadd.f32 %v6873_v20, %v8369_v61  ;;  %v2875_v10 = vpop.f32.mrb[5].mxu0 }
 0x301   : > { %v3029_v12 = vadd.f32 %v8369_v61, %v2875_v10  ;;  %v6874_v14 = vpop.f32.mrb[6].mxu0 }
 0x302   : > { %v3063_v22 = vmax.f32 %v3031_v5, 0.0  ;;  %v3032_v23 = vadd.f32 %v6874_v14, %v8369_v61  ;;  %v2878_v29 = vpop.f32.mrb[7].mxu0 }
 0x303   : > { %v3061_v30 = vmax.f32 %v3029_v12, 0.0  ;;  %v3030_v6 = vadd.f32 %v8369_v61, %v2878_v29  ;;  %v3175_v15 = vld [vmem:[#allocation3 + $0x31] sm:$0xff] }
 0x304   : > { %3096 = vst.msk [vmem:[#allocation3 + $0x61] sm:$0xff] %vm334_vm1, %v3063_v22  ;;  %v3064_v37 = vmax.f32 %v3032_v23, 0.0  ;;  %v3173_v54 = vld [vmem:[#allocation3 + $0x19] sm:$0xff] }
 0x305   : > { %3094 = vst.msk [vmem:[#allocation3 + $0x49] sm:$0xff] %vm334_vm1, %v3061_v30  ;;  %v3062_v44 = vmax.f32 %v3030_v6, 0.0  ;;  %v3176_v45 = vld [vmem:[#allocation3 + $0x39] sm:$0xff] }
 0x306   : > { %3097 = vst.msk [vmem:[#allocation3 + $0x69] sm:$0xff] %vm334_vm1, %v3064_v37  ;;  %v3174_v55 = vld [vmem:[#allocation3 + $0x21] sm:$0xff]  ;;  %v8391_v28 = vpack.c.bf16 %v3176_v45, %v3175_v15 }
 0x307   : > { %3095 = vst.msk [vmem:[#allocation3 + $0x51] sm:$0xff] %vm334_vm1, %v3062_v44  ;;  %v6877_v63 = vpop.f32.mrb[8].mxu0  ;;  %v8387_v4 = vpack.c.bf16 %v3174_v55, %v3173_v54 }
 0x308   : > { %v3035_v17 = vadd.f32 %v6877_v63, %v8369_v61  ;;  %v2891_v25 = vpop.f32.mrb[9].mxu0 }
 0x309   : > { %v3033_v32 = vadd.f32 %v8369_v61, %v2891_v25  ;;  %v6878_v33 = vpop.f32.mrb[10].mxu0  ;;  %6902 = vmatmul.mubr.msk.bf16.vlgmr.msra.gmra.mrb[0].mxu1 %vm334_vm1, %v8387_v4 }
 0x30a   : > { %v3067_v39 = vmax.f32 %v3035_v17, 0.0  ;;  %v3036_v43 = vadd.f32 %v6878_v33, %v8369_v61  ;;  %6934 = vmatpush3.bf16.msra.mxu1 %v3482_v11  ;;  %v2894_v50 = vpop.f32.mrb[11].mxu0  ;;  %6905 = vmatprep.mubr.msk.bf16.mxu1 %vm334_vm1, %v8391_v28 }
 0x30b   : > { %v3065_v56 = vmax.f32 %v3033_v32, 0.0  ;;  %v3034_v57 = vadd.f32 %v8369_v61, %v2894_v50  ;;  %7728 = vmatprep.subr.msk.bf16.mxu1 %vm581_vm0, %v8396_v31  ;;  %v3179_v35 = vld [vmem:[#allocation3 + $0x61] sm:$0xff] }
 0x30c   : > { %3100 = vst.msk [vmem:[#allocation3 + $0x91] sm:$0xff] %vm334_vm1, %v3067_v39  ;;  %v3068_v13 = vmax.f32 %v3036_v43, 0.0  ;;  %v3177_v2 = vld [vmem:[#allocation3 + $0x49] sm:$0xff] }
 0x30d   : > { %3098 = vst.msk [vmem:[#allocation3 + $0x79] sm:$0xff] %vm334_vm1, %v3065_v56  ;;  %v3066_v27 = vmax.f32 %v3034_v57, 0.0  ;;  %v3180_v62 = vld [vmem:[#allocation3 + $0x69] sm:$0xff] }
 0x30e   : > { %3101 = vst.msk [vmem:[#allocation3 + $0x99] sm:$0xff] %vm334_vm1, %v3068_v13  ;;  %v3178_v3 = vld [vmem:[#allocation3 + $0x51] sm:$0xff]  ;;  %v8414_v46 = vpack.c.bf16 %v3180_v62, %v3179_v35 }
 0x30f   : > { %3099 = vst.msk [vmem:[#allocation3 + $0x81] sm:$0xff] %vm334_vm1, %v3066_v27  ;;  %v6881_v21 = vpop.f32.mrb[12].mxu0  ;;  %v8411_v26 = vpack.c.bf16 %v3178_v3, %v3177_v2 }
 0x310   : > { %v3039_v36 = vadd.f32 %v6881_v21, %v8369_v61  ;;  %v2907_v40 = vpop.f32.mrb[13].mxu0 }
 0x311   : > { %v3037_v59 = vadd.f32 %v8369_v61, %v2907_v40  ;;  %v6882_v0 = vpop.f32.mrb[14].mxu0  ;;  %6906 = vmatmul.mubr.msk.bf16.gmra.mrb[4].mxu1 %vm334_vm1, %v8411_v26 }
 0x312   : > { %v3071_v1 = vmax.f32 %v3039_v36, 0.0  ;;  %v3040_v7 = vadd.f32 %v6882_v0, %v8369_v61  ;;  %v2910_v24 = vpop.f32.mrb[15].mxu0  ;;  %6909 = vmatprep.mubr.msk.bf16.mxu1 %vm334_vm1, %v8414_v46 }
 0x313   : > { %v3069_v34 = vmax.f32 %v3037_v59, 0.0  ;;  %v3038_v16 = vadd.f32 %v8369_v61, %v2910_v24  ;;  %v3183_v38 = vld [vmem:[#allocation3 + $0x91] sm:$0xff] }
 0x314   : > { %3104 = vst.msk [vmem:[#allocation3 + $0xc1] sm:$0xff] %vm334_vm1, %v3071_v1  ;;  %v3072_v48 = vmax.f32 %v3040_v7, 0.0  ;;  %v3181_v8 = vld [vmem:[#allocation3 + $0x79] sm:$0xff] }
 0x315   : > { %3102 = vst.msk [vmem:[#allocation3 + $0xa9] sm:$0xff] %vm334_vm1, %v3069_v34  ;;  %v3070_v49 = vmax.f32 %v3038_v16, 0.0  ;;  %v3184_v60 = vld [vmem:[#allocation3 + $0x99] sm:$0xff] }
 0x316   : > { %3105 = vst.msk [vmem:[#allocation3 + $0xc9] sm:$0xff] %vm334_vm1, %v3072_v48  ;;  %v3182_v9 = vld [vmem:[#allocation3 + $0x81] sm:$0xff]  ;;  %v8430_v41 = vpack.c.bf16 %v3184_v60, %v3183_v38 }
 0x317   : > { %3103 = vst.msk [vmem:[#allocation3 + $0xb1] sm:$0xff] %vm334_vm1, %v3070_v49  ;;  %v6885_v18 = vpop.f32.mrb[16].mxu0  ;;  %v8427_v19 = vpack.c.bf16 %v3182_v9, %v3181_v8 }
 0x318   : > { %v3043_v42 = vadd.f32 %v6885_v18, %v8369_v61  ;;  %v2923_v51 = vpop.f32.mrb[17].mxu0 }
 0x319   : > { %v3041_v47 = vadd.f32 %v8369_v61, %v2923_v51  ;;  %v6886_v52 = vpop.f32.mrb[18].mxu0  ;;  %6910 = vmatmul.mubr.msk.bf16.gmra.mrb[8].mxu1 %vm334_vm1, %v8427_v19 }
 0x31a   : > { %v3075_v53 = vmax.f32 %v3043_v42, 0.0  ;;  %v3044_v58 = vadd.f32 %v6886_v52, %v8369_v61  ;;  %v2926_v20 = vpop.f32.mrb[19].mxu0  ;;  %6913 = vmatprep.mubr.msk.bf16.mxu1 %vm334_vm1, %v8430_v41 }
 0x31b   : > { %v3073_v5 = vmax.f32 %v3041_v47, 0.0  ;;  %v3042_v10 = vadd.f32 %v8369_v61, %v2926_v20  ;;  %v3187_v37 = vld [vmem:[#allocation3 + $0xc1] sm:$0xff] }
 0x31c   : > { %3108 = vst.msk [vmem:[#allocation3 + $0xf1] sm:$0xff] %vm334_vm1, %v3075_v53  ;;  %v3076_v12 = vmax.f32 %v3044_v58, 0.0  ;;  %v3185_v23 = vld [vmem:[#allocation3 + $0xa9] sm:$0xff] }
 0x31d   : > { %3106 = vst.msk [vmem:[#allocation3 + $0xd9] sm:$0xff] %vm334_vm1, %v3073_v5  ;;  %v3074_v14 = vmax.f32 %v3042_v10, 0.0  ;;  %v3188_v22 = vld [vmem:[#allocation3 + $0xc9] sm:$0xff] }
 0x31e   : > { %3109 = vst.msk [vmem:[#allocation3 + $0xf9] sm:$0xff] %vm334_vm1, %v3076_v12  ;;  %v3186_v29 = vld [vmem:[#allocation3 + $0xb1] sm:$0xff]  ;;  %v8446_v54 = vpack.c.bf16 %v3188_v22, %v3187_v37  ;;  %v3123_v37 = vld [vmem:[#allocation3 + $0x8] sm:$0xff] }
 0x31f   : > { %3107 = vst.msk [vmem:[#allocation3 + $0xe1] sm:$0xff] %vm334_vm1, %v3074_v14  ;;  %v6889_v30 = vpop.f32.mrb[20].mxu0  ;;  %v8443_v6 = vpack.c.bf16 %v3186_v29, %v3185_v23 }
 0x320   : > { %v3047_v44 = vadd.f32 %v6889_v30, %v8369_v61  ;;  %v2939_v45 = vpop.f32.mrb[21].mxu0 }
 0x321   : > { %v3045_v55 = vadd.f32 %v8369_v61, %v2939_v45  ;;  %v6890_v63 = vpop.f32.mrb[22].mxu0  ;;  %6914 = vmatmul.mubr.msk.bf16.gmra.mrb[12].mxu1 %vm334_vm1, %v8443_v6 }
 0x322   : > { %v3079_v11 = vmax.f32 %v3047_v44, 0.0  ;;  %v3048_v15 = vadd.f32 %v6890_v63, %v8369_v61  ;;  %v2942_v17 = vpop.f32.mrb[23].mxu0  ;;  %6917 = vmatprep.mubr.msk.bf16.mxu1 %vm334_vm1, %v8446_v54 }
 0x323   : > { %v3077_v25 = vmax.f32 %v3045_v55, 0.0  ;;  %v3046_v32 = vadd.f32 %v8369_v61, %v2942_v17  ;;  %v3191_v27 = vld [vmem:[#allocation3 + $0xf1] sm:$0xff] }
 0x324   : > { %3112 = vst.msk [vmem:[#allocation3 + $0x121] sm:$0xff] %vm334_vm1, %v3079_v11  ;;  %v3080_v33 = vmax.f32 %v3048_v15, 0.0  ;;  %v3189_v50 = vld [vmem:[#allocation3 + $0xd9] sm:$0xff] }
 0x325   : > { %3110 = vst.msk [vmem:[#allocation3 + $0x109] sm:$0xff] %vm334_vm1, %v3077_v25  ;;  %v3078_v39 = vmax.f32 %v3046_v32, 0.0  ;;  %v3192_v43 = vld [vmem:[#allocation3 + $0xf9] sm:$0xff]  ;;  %v3744_v32 = vsel %vm581_vm0, %v8396_v31, 0  ;;  %v3131_v31 = vld [vmem:[#allocation3 + $0x68] sm:$0xff] }
 0x326   : > { %3113 = vst.msk [vmem:[#allocation3 + $0x129] sm:$0xff] %vm334_vm1, %v3080_v33  ;;  %v3190_v56 = vld [vmem:[#allocation3 + $0xe1] sm:$0xff]  ;;  %v8462_v3 = vpack.c.bf16 %v3192_v43, %v3191_v27  ;;  %v3127_v15 = vld [vmem:[#allocation3 + $0x38] sm:$0xff]  ;;  %v3126_v33 = vld [vmem:[#allocation3 + $0x30] sm:$0xff] }
 0x327   : > { %3111 = vst.msk [vmem:[#allocation3 + $0x111] sm:$0xff] %vm334_vm1, %v3078_v39  ;;  %v6893_v57 = vpop.f32.mrb[24].mxu0  ;;  %v8459_v13 = vpack.c.bf16 %v3190_v56, %v3189_v50  ;;  %v3125_v11 = vld [vmem:[#allocation3 + $0x20] sm:$0xff]  ;;  %v3124_v17 = vld [vmem:[#allocation3 + $0x18] sm:$0xff]  ;;  %v8508_v39 = vpack.c.bf16 %v3127_v15, %v3126_v33  ;;  %v8513_v43 = vld [vmem:[%s8964_s3 + $0x6] sm:$0x3] }
 0x328   : > { %v3051_v62 = vadd.f32 %v6893_v57, %v8369_v61  ;;  %v2955_v2 = vpop.f32.mrb[25].mxu0  ;;  %v8504_v25 = vpack.c.bf16 %v3125_v11, %v3124_v17  ;;  %v3129_v50 = vld [vmem:[#allocation3 + $0x50] sm:$0xff]  ;;  %v3128_v56 = vld [vmem:[#allocation3 + $0x48] sm:$0xff]  ;;  %v3130_v27 = vld [vmem:[#allocation3 + $0x60] sm:$0xff] }
 0x329   : > { %v3049_v21 = vadd.f32 %v8369_v61, %v2955_v2  ;;  %v6894_v35 = vpop.f32.mrb[26].mxu0  ;;  %6918 = vmatmul.mubr.msk.bf16.gmra.mrb[16].mxu1 %vm334_vm1, %v8459_v13  ;;  %v8521_v57 = vpack.c.bf16 %v3129_v50, %v3128_v56  ;;  %v3133_v2 = vld [vmem:[#allocation3 + $0x80] sm:$0xff] }
 0x32a   : > { %v3083_v36 = vmax.f32 %v3051_v62, 0.0  ;;  %v3052_v40 = vadd.f32 %v6894_v35, %v8369_v61  ;;  %v2958_v59 = vpop.f32.mrb[27].mxu0  ;;  %6921 = vmatprep.mubr.msk.bf16.mxu1 %vm334_vm1, %v8462_v3  ;;  %v8523_v62 = vpack.c.bf16 %v3131_v31, %v3130_v27  ;;  %v3132_v35 = vld [vmem:[#allocation3 + $0x78] sm:$0xff]  ;;  %v3648_v17 = vld [vmem:[#allocation3 + $0x22] sm:$0xff]  ;;  %v4038_v31 = vsel %vm581_vm0, %v8513_v43, 0 }
 0x32b   : > { %v3081_v0 = vmax.f32 %v3049_v21, 0.0  ;;  %v3050_v1 = vadd.f32 %v8369_v61, %v2958_v59  ;;  %v3195_v8 = vld [vmem:[#allocation3 + $0x121] sm:$0xff]  ;;  %v3135_v21 = vld [vmem:[#allocation3 + $0x98] sm:$0xff] }
 0x32c   : > { %3116 = vst.msk [vmem:[#allocation3 + $0x151] sm:$0xff] %vm334_vm1, %v3083_v36  ;;  %v3084_v7 = vmax.f32 %v3052_v40, 0.0  ;;  %v3193_v16 = vld [vmem:[#allocation3 + $0x109] sm:$0xff]  ;;  %v8529_v36 = vpack.c.bf16 %v3133_v2, %v3132_v35  ;;  %v3647_v15 = vld [vmem:[#allocation3 + $0x1a] sm:$0xff]  ;;  %v6154_v27 = vld [vmem:[%s8964_s3 + $0x8] sm:$0x3] }
 0x32d   : > { %3114 = vst.msk [vmem:[#allocation3 + $0x139] sm:$0xff] %vm334_vm1, %v3081_v0  ;;  %v3082_v24 = vmax.f32 %v3050_v1, 0.0  ;;  %v3196_v34 = vld [vmem:[#allocation3 + $0x129] sm:$0xff]  ;;  %v3650_v33 = vld [vmem:[#allocation3 + $0x3a] sm:$0xff]  ;;  %v8574_v50 = vpack.c.bf16 %v3648_v17, %v3647_v15 }
 0x32e   : > { %3117 = vst.msk [vmem:[#allocation3 + $0x159] sm:$0xff] %vm334_vm1, %v3084_v7  ;;  %v3194_v48 = vld [vmem:[#allocation3 + $0x111] sm:$0xff]  ;;  %v8478_v38 = vpack.c.bf16 %v3196_v34, %v3195_v8  ;;  %v3139_v1 = vld [vmem:[#allocation3 + $0xc8] sm:$0xff]  ;;  %v3138_v34 = vld [vmem:[#allocation3 + $0xc0] sm:$0xff] }
 0x32f   : > { %3115 = vst.msk [vmem:[#allocation3 + $0x141] sm:$0xff] %vm334_vm1, %v3082_v24  ;;  %v6897_v49 = vpop.f32.mrb[28].mxu0  ;;  %v8475_v60 = vpack.c.bf16 %v3194_v48, %v3193_v16  ;;  %v3134_v40 = vld [vmem:[#allocation3 + $0x90] sm:$0xff]  ;;  %v3136_v7 = vld [vmem:[#allocation3 + $0xa8] sm:$0xff]  ;;  %v8539_v16 = vpack.c.bf16 %v3139_v1, %v3138_v34  ;;  %v3141_v48 = vld [vmem:[#allocation3 + $0xe0] sm:$0xff] }
 0x330   : > { %v3055_v9 = vadd.f32 %v6897_v49, %v8369_v61  ;;  %v2971_v18 = vpop.f32.mrb[29].mxu0  ;;  %v8531_v59 = vpack.c.bf16 %v3135_v21, %v3134_v40  ;;  %v3137_v0 = vld [vmem:[#allocation3 + $0xb0] sm:$0xff]  ;;  %v3143_v49 = vld [vmem:[#allocation3 + $0xf8] sm:$0xff]  ;;  %v3653_v35 = vld [vmem:[#allocation3 + $0x62] sm:$0xff] }
 0x331   : > { %v3053_v42 = vadd.f32 %v8369_v61, %v2971_v18  ;;  %v6898_v51 = vpop.f32.mrb[30].mxu0  ;;  %6922 = vmatmul.mubr.msk.bf16.gmra.mrb[20].mxu1 %vm334_vm1, %v8475_v60  ;;  %v8537_v24 = vpack.c.bf16 %v3137_v0, %v3136_v7  ;;  %v3140_v8 = vld [vmem:[#allocation3 + $0xd8] sm:$0xff]  ;;  %v3142_v18 = vld [vmem:[#allocation3 + $0xf0] sm:$0xff]  ;;  %v3656_v7 = vld [vmem:[#allocation3 + $0x82] sm:$0xff] }
 0x332   : > { %v3087_v47 = vmax.f32 %v3055_v9, 0.0  ;;  %v3056_v52 = vadd.f32 %v6898_v51, %v8369_v61  ;;  %v2974_v53 = vpop.f32.mrb[31].mxu0  ;;  %6925 = vmatprep.mubr.msk.bf16.mxu1 %vm334_vm1, %v8478_v38  ;;  %v8545_v9 = vpack.c.bf16 %v3141_v48, %v3140_v8  ;;  %v3145_v51 = vld [vmem:[#allocation3 + $0x110] sm:$0xff]  ;;  %v3655_v1 = vld [vmem:[#allocation3 + $0x7a] sm:$0xff]  ;;  %v3669_v15 = vld [vmem:[#allocation3 + $0x122] sm:$0xff] }
 0x333   : > { %v3085_v58 = vmax.f32 %v3053_v42, 0.0  ;;  %v3054_v20 = vadd.f32 %v8369_v61, %v2974_v53  ;;  %v3199_v29 = vld [vmem:[#allocation3 + $0x151] sm:$0xff]  ;;  %v3122_v61 = vld [vmem:[#allocation3] sm:$0xff]  ;;  %v8547_v42 = vpack.c.bf16 %v3143_v49, %v3142_v18  ;;  %v8596_v49 = vpack.c.bf16 %v3656_v7, %v3655_v1 }
 0x334   : > { %3120 = vst.msk [vmem:[#allocation3 + $0x181] sm:$0xff] %vm334_vm1, %v3087_v47  ;;  %v3088_v5 = vmax.f32 %v3056_v52, 0.0  ;;  %v3197_v14 = vld [vmem:[#allocation3 + $0x139] sm:$0xff]  ;;  %v3154_v55 = vpack.c.bf16 %v3123_v37, %v3122_v61  ;;  %v3147_v47 = vld [vmem:[#allocation3 + $0x128] sm:$0xff] }
 0x335   : > { %3118 = vst.msk [vmem:[#allocation3 + $0x169] sm:$0xff] %vm334_vm1, %v3085_v58  ;;  %v3086_v10 = vmax.f32 %v3054_v20, 0.0  ;;  %v3200_v12 = vld [vmem:[#allocation3 + $0x159] sm:$0xff]  ;;  %v3144_v52 = vld [vmem:[#allocation3 + $0x108] sm:$0xff] }
 0x336   : > { %3121 = vst.msk [vmem:[#allocation3 + $0x189] sm:$0xff] %vm334_vm1, %v3088_v5  ;;  %v3198_v22 = vld [vmem:[#allocation3 + $0x141] sm:$0xff]  ;;  %v8493_v30 = vpack.c.bf16 %v3200_v12, %v3199_v29  ;;  %v8553_v53 = vpack.c.bf16 %v3145_v51, %v3144_v52  ;;  %v3148_v12 = vld [vmem:[#allocation3 + $0x138] sm:$0xff]  ;;  %v3646_v37 = vld [vmem:[#allocation3 + $0xa] sm:$0xff] }
 0x337   : > { %3119 = vst.msk [vmem:[#allocation3 + $0x171] sm:$0xff] %vm334_vm1, %v3086_v10  ;;  %v8491_v23 = vpack.c.bf16 %v3198_v22, %v3197_v14  ;;  %v3146_v58 = vld [vmem:[#allocation3 + $0x120] sm:$0xff]  ;;  %v3151_v10 = vld [vmem:[#allocation3 + $0x158] sm:$0xff]  ;;  %v3150_v22 = vld [vmem:[#allocation3 + $0x150] sm:$0xff] }
 0x338   : > { %v8555_v20 = vpack.c.bf16 %v3147_v47, %v3146_v58  ;;  %v3149_v5 = vld [vmem:[#allocation3 + $0x140] sm:$0xff]  ;;  %v8563_v29 = vpack.c.bf16 %v3151_v10, %v3150_v22  ;;  %v3651_v2 = vld [vmem:[#allocation3 + $0x4a] sm:$0xff]  ;;  %v3652_v21 = vld [vmem:[#allocation3 + $0x52] sm:$0xff] }
 0x339   : > { %6926 = vmatmul.mubr.msk.bf16.gmra.mrb[24].mxu1 %vm334_vm1, %v8491_v23  ;;  %v8561_v14 = vpack.c.bf16 %v3149_v5, %v3148_v12  ;;  %v3645_v61 = vld [vmem:[#allocation3 + $0x2] sm:$0xff]  ;;  %v3654_v40 = vld [vmem:[#allocation3 + $0x6a] sm:$0xff]  ;;  %v3657_v34 = vld [vmem:[#allocation3 + $0x92] sm:$0xff] }
 0x33a   : > { %6929 = vmatprep.mubr.msk.bf16.mxu1 %vm334_vm1, %v8493_v30  ;;  %v8590_v0 = vpack.c.bf16 %v3654_v40, %v3653_v35  ;;  %v3658_v48 = vld [vmem:[#allocation3 + $0x9a] sm:$0xff]  ;;  %v3659_v18 = vld [vmem:[#allocation3 + $0xaa] sm:$0xff]  ;;  %v3660_v51 = vld [vmem:[#allocation3 + $0xb2] sm:$0xff] }
 0x33b   : > { %v8598_v8 = vpack.c.bf16 %v3658_v48, %v3657_v34  ;;  %v3661_v47 = vld [vmem:[#allocation3 + $0xc2] sm:$0xff]  ;;  %v3662_v52 = vld [vmem:[#allocation3 + $0xca] sm:$0xff]  ;;  %v8604_v58 = vpack.c.bf16 %v3660_v51, %v3659_v18  ;;  %v3663_v10 = vld [vmem:[#allocation3 + $0xda] sm:$0xff]  ;;  %v4332_v18 = vsel %vm581_vm0, %v6154_v27, 0 }
 0x33c   : > { %v3201_v44 = vld [vmem:[#allocation3 + $0x169] sm:$0xff]  ;;  %v8606_v5 = vpack.c.bf16 %v3662_v52, %v3661_v47  ;;  %v3665_v22 = vld [vmem:[#allocation3 + $0xf2] sm:$0xff]  ;;  %v3674_v35 = vld [vmem:[#allocation3 + $0x15a] sm:$0xff] }
 0x33d   : > { %v3664_v12 = vld [vmem:[#allocation3 + $0xe2] sm:$0xff]  ;;  %v3670_v17 = vld [vmem:[#allocation3 + $0x12a] sm:$0xff]  ;;  %v6171_v51 = vld [vmem:[%s8964_s3 + $0xa] sm:$0x3] }
 0x33e   : > { %v3202_v45 = vld [vmem:[#allocation3 + $0x171] sm:$0xff]  ;;  %v4626_v52 = vsel %vm581_vm0, %v6171_v51, 0 }
 0x33f   : > { %v8499_v63 = vpack.c.bf16 %v3202_v45, %v3201_v44  ;;  %v3153_v44 = vld [vmem:[#allocation3 + $0x170] sm:$0xff]  ;;  %v3152_v45 = vld [vmem:[#allocation3 + $0x168] sm:$0xff] }
 0x340   : > { %v8569_v11 = vpack.c.bf16 %v3153_v44, %v3152_v45  ;;  %v3667_v45 = vld [vmem:[#allocation3 + $0x10a] sm:$0xff]  ;;  %v3676_v34 = vld [vmem:[#allocation3 + $0x172] sm:$0xff] }
 0x341   : > { %6930 = vmatmul.mubr.msk.bf16.gmra.mrb[28].mxu1 %vm334_vm1, %v8499_v63  ;;  %v3675_v7 = vld [vmem:[#allocation3 + $0x16a] sm:$0xff] }
 0x342   : > { %6935 = vmatprep.mubr.msk.bf16.mxu1 %vm334_vm1, %v3154_v55  ;;  %v3677_v55 = vpack.c.bf16 %v3646_v37, %v3645_v61  ;;  %v3666_v61 = vld [vmem:[#allocation3 + $0xfa] sm:$0xff]  ;;  %v8612_v37 = vpack.c.bf16 %v3664_v12, %v3663_v10  ;;  %v8636_v48 = vpack.c.bf16 %v3676_v34, %v3675_v7 }
 0x343   : > { %v8614_v44 = vpack.c.bf16 %v3666_v61, %v3665_v22  ;;  %v6188_v10 = vld [vmem:[%s8964_s3 + $0xc] sm:$0x3]  ;;  %v6222_v61 = vld [vmem:[%s8964_s3 + $0x10] sm:$0x3] }
 0x349   : > { %6936 = vmatmul.mubr.msk.bf16.vlgmr.msra.gmra.mrb[0].mxu1 %vm334_vm1, %v8504_v25 }
 0x34a   : > { %6968 = vmatpush3.bf16.msra.mxu1 %v3744_v32  ;;  %6939 = vmatprep.mubr.msk.bf16.mxu1 %vm334_vm1, %v8508_v39  ;;  %v3649_v32 = vld [vmem:[#allocation3 + $0x32] sm:$0xff] }
 0x34b   : > { %7729 = vmatprep.subr.msk.bf16.mxu1 %vm581_vm0, %v8513_v43  ;;  %v8578_v56 = vpack.c.bf16 %v3650_v33, %v3649_v32  ;;  %v8588_v43 = vpack.c.bf16 %v3652_v21, %v3651_v2  ;;  %v8622_v33 = vpack.c.bf16 %v3670_v17, %v3669_v15  ;;  %v3672_v2 = vld [vmem:[#allocation3 + $0x142] sm:$0xff]  ;;  %v3673_v21 = vld [vmem:[#allocation3 + $0x152] sm:$0xff] }
 0x34c   : > { %v8630_v1 = vpack.c.bf16 %v3674_v35, %v3673_v21  ;;  %v5124_v17 = vld [vmem:[#allocation3 + $0x91] sm:$0xff] }
 0x351   : > { %6940 = vmatmul.mubr.msk.bf16.gmra.mrb[4].mxu1 %vm334_vm1, %v8521_v57 }
 0x352   : > { %6943 = vmatprep.mubr.msk.bf16.mxu1 %vm334_vm1, %v8523_v62 }
 0x359   : > { %6944 = vmatmul.mubr.msk.bf16.gmra.mrb[8].mxu1 %vm334_vm1, %v8529_v36 }
 0x35a   : > { %6947 = vmatprep.mubr.msk.bf16.mxu1 %vm334_vm1, %v8531_v59 }
 0x361   : > { %6948 = vmatmul.mubr.msk.bf16.gmra.mrb[12].mxu1 %vm334_vm1, %v8537_v24 }
 0x362   : > { %6951 = vmatprep.mubr.msk.bf16.mxu1 %vm334_vm1, %v8539_v16 }
 0x369   : > { %6952 = vmatmul.mubr.msk.bf16.gmra.mrb[16].mxu1 %vm334_vm1, %v8545_v9 }
 0x36a   : > { %6955 = vmatprep.mubr.msk.bf16.mxu1 %vm334_vm1, %v8547_v42 }
 0x371   : > { %6956 = vmatmul.mubr.msk.bf16.gmra.mrb[20].mxu1 %vm334_vm1, %v8553_v53 }
 0x372   : > { %6959 = vmatprep.mubr.msk.bf16.mxu1 %vm334_vm1, %v8555_v20 }
 0x379   : > { %6960 = vmatmul.mubr.msk.bf16.gmra.mrb[24].mxu1 %vm334_vm1, %v8561_v14 }
 0x37a   : > { %6963 = vmatprep.mubr.msk.bf16.mxu1 %vm334_vm1, %v8563_v29 }
 0x381   : > { %6964 = vmatmul.mubr.msk.bf16.gmra.mrb[28].mxu1 %vm334_vm1, %v8569_v11 }
 0x382   : > { %6969 = vmatprep.mubr.msk.bf16.mxu1 %vm334_vm1, %v3677_v55  ;;  %v3668_v55 = vld [vmem:[#allocation3 + $0x112] sm:$0xff] }
 0x383   : > { %v8620_v32 = vpack.c.bf16 %v3668_v55, %v3667_v45  ;;  %v5125_v45 = vld [vmem:[#allocation3 + $0x99] sm:$0xff] }
 0x384   : > { %v5122_v55 = vld [vmem:[#allocation3 + $0x79] sm:$0xff] }
 0x389   : > { %6970 = vmatmul.mubr.msk.bf16.vlgmr.msra.gmra.mrb[0].mxu1 %vm334_vm1, %v8574_v50 }
 0x38a   : > { %7002 = vmatpush3.bf16.msra.mxu1 %v4038_v31  ;;  %6973 = vmatprep.mubr.msk.bf16.mxu1 %vm334_vm1, %v8578_v56  ;;  %v3671_v31 = vld [vmem:[#allocation3 + $0x13a] sm:$0xff] }
 0x38b   : > { %7730 = vmatprep.subr.msk.bf16.mxu1 %vm581_vm0, %v6154_v27  ;;  %v8628_v40 = vpack.c.bf16 %v3672_v2, %v3671_v31  ;;  %v3969_v27 = vld [vmem:[#allocation3 + $0x180] sm:$0xff]  ;;  %v5152_v31 = vpack.c.bf16 %v5125_v45, %v5124_v17 }
 0x391   : > { %6974 = vmatmul.mubr.msk.bf16.gmra.mrb[4].mxu1 %vm334_vm1, %v8588_v43 }
 0x392   : > { %6977 = vmatprep.mubr.msk.bf16.mxu1 %vm334_vm1, %v8590_v0 }
 0x399   : > { %6978 = vmatmul.mubr.msk.bf16.gmra.mrb[8].mxu1 %vm334_vm1, %v8596_v49 }
 0x39a   : > { %6981 = vmatprep.mubr.msk.bf16.mxu1 %vm334_vm1, %v8598_v8 }
 0x3a1   : > { %6982 = vmatmul.mubr.msk.bf16.gmra.mrb[12].mxu1 %vm334_vm1, %v8604_v58 }
 0x3a2   : > { %6985 = vmatprep.mubr.msk.bf16.mxu1 %vm334_vm1, %v8606_v5 }
 0x3a9   : > { %6986 = vmatmul.mubr.msk.bf16.gmra.mrb[16].mxu1 %vm334_vm1, %v8612_v37 }
 0x3aa   : > { %6989 = vmatprep.mubr.msk.bf16.mxu1 %vm334_vm1, %v8614_v44 }
 0x3b1   : > { %6990 = vmatmul.mubr.msk.bf16.gmra.mrb[20].mxu1 %vm334_vm1, %v8620_v32 }
 0x3b2   : > { %6993 = vmatprep.mubr.msk.bf16.mxu1 %vm334_vm1, %v8622_v33 }
 0x3b9   : > { %6994 = vmatmul.mubr.msk.bf16.gmra.mrb[24].mxu1 %vm334_vm1, %v8628_v40 }
 0x3ba   : > { %6997 = vmatprep.mubr.msk.bf16.mxu1 %vm334_vm1, %v8630_v1 }
 0x3c1   : > { %6998 = vmatmul.mubr.msk.bf16.gmra.mrb[28].mxu1 %vm334_vm1, %v8636_v48 }
 0x3c2   : > { %7003 = vmatprep.mubr.msk.bf16.mxu1 %vm334_vm1, %v8504_v25  ;;  %v3970_v25 = vld [vmem:[#allocation3 + $0x188] sm:$0xff] }
 0x3c3   : > { %v8675_v47 = vpack.c.bf16 %v3970_v25, %v3969_v27  ;;  %v5747_v27 = vld [vmem:[#allocation2 + $0x49] sm:$0xff] }
 0x3c9   : > { %7004 = vmatmul.mubr.msk.bf16.vlgmr.msra.gmra.mrb[0].mxu1 %vm334_vm1, %v8508_v39 }
 0x3ca   : > { %7036 = vmatpush3.bf16.msra.mxu1 %v4332_v18  ;;  %7007 = vmatprep.mubr.msk.bf16.mxu1 %vm334_vm1, %v8521_v57  ;;  %v5749_v18 = vld [vmem:[#allocation2 + $0x61] sm:$0xff] }
 0x3cb   : > { %7731 = vmatprep.subr.msk.bf16.mxu1 %vm581_vm0, %v6171_v51 }
 0x3d1   : > { %7008 = vmatmul.mubr.msk.bf16.gmra.mrb[4].mxu1 %vm334_vm1, %v8523_v62 }
 0x3d2   : > { %7011 = vmatprep.mubr.msk.bf16.mxu1 %vm334_vm1, %v8529_v36 }
 0x3d9   : > { %7012 = vmatmul.mubr.msk.bf16.gmra.mrb[8].mxu1 %vm334_vm1, %v8531_v59 }
 0x3da   : > { %7015 = vmatprep.mubr.msk.bf16.mxu1 %vm334_vm1, %v8537_v24 }
 0x3e1   : > { %7016 = vmatmul.mubr.msk.bf16.gmra.mrb[12].mxu1 %vm334_vm1, %v8539_v16 }
 0x3e2   : > { %7019 = vmatprep.mubr.msk.bf16.mxu1 %vm334_vm1, %v8545_v9 }
 0x3e9   : > { %7020 = vmatmul.mubr.msk.bf16.gmra.mrb[16].mxu1 %vm334_vm1, %v8547_v42 }
 0x3ea   : > { %7023 = vmatprep.mubr.msk.bf16.mxu1 %vm334_vm1, %v8553_v53 }
 0x3f1   : > { %7024 = vmatmul.mubr.msk.bf16.gmra.mrb[20].mxu1 %vm334_vm1, %v8555_v20 }
 0x3f2   : > { %7027 = vmatprep.mubr.msk.bf16.mxu1 %vm334_vm1, %v8561_v14 }
 0x3f9   : > { %7028 = vmatmul.mubr.msk.bf16.gmra.mrb[24].mxu1 %vm334_vm1, %v8563_v29 }
 0x3fa   : > { %7031 = vmatprep.mubr.msk.bf16.mxu1 %vm334_vm1, %v8569_v11 }
 0x401   : > { %7032 = vmatmul.mubr.msk.bf16.gmra.mrb[28].mxu1 %vm334_vm1, %v8675_v47 }
 0x402   : > { %7037 = vmatprep.mubr.msk.bf16.mxu1 %vm334_vm1, %v8387_v4  ;;  %v4264_v4 = vld [vmem:[#allocation3 + $0x189] sm:$0xff] }
 0x409   : > { %7038 = vmatmul.mubr.msk.bf16.vlgmr.msra.gmra.mrb[0].mxu1 %vm334_vm1, %v8391_v28  ;;  %v4263_v28 = vld [vmem:[#allocation3 + $0x181] sm:$0xff] }
 0x40a   : > { %7070 = vmatpush3.bf16.msra.mxu1 %v4626_v52  ;;  %7041 = vmatprep.mubr.msk.bf16.mxu1 %vm334_vm1, %v8411_v26  ;;  %v8714_v26 = vpack.c.bf16 %v4264_v4, %v4263_v28 }
 0x40b   : > { %7732 = vmatprep.subr.msk.bf16.mxu1 %vm581_vm0, %v6188_v10 }
 0x411   : > { %7042 = vmatmul.mubr.msk.bf16.gmra.mrb[4].mxu1 %vm334_vm1, %v8414_v46  ;;  %v4921_v46 = vsel %vm581_vm0, %v6188_v10, 0  ;;  %v5750_v10 = vld [vmem:[#allocation2 + $0x69] sm:$0xff] }
 0x412   : > { %7045 = vmatprep.mubr.msk.bf16.mxu1 %vm334_vm1, %v8427_v19  ;;  %v6205_v19 = vld [vmem:[%s8964_s3 + $0xe] sm:$0x3] }
 0x413   : > { %v5215_v22 = vsel %vm581_vm0, %v6205_v19, 0 }
 0x419   : > { %7046 = vmatmul.mubr.msk.bf16.gmra.mrb[8].mxu1 %vm334_vm1, %v8430_v41  ;;  %v4557_v41 = vld [vmem:[#allocation3 + $0x182] sm:$0xff] }
 0x41a   : > { %7049 = vmatprep.mubr.msk.bf16.mxu1 %vm334_vm1, %v8443_v6 }
 0x421   : > { %7050 = vmatmul.mubr.msk.bf16.gmra.mrb[12].mxu1 %vm334_vm1, %v8446_v54 }
 0x422   : > { %7053 = vmatprep.mubr.msk.bf16.mxu1 %vm334_vm1, %v8459_v13 }
 0x429   : > { %7054 = vmatmul.mubr.msk.bf16.gmra.mrb[16].mxu1 %vm334_vm1, %v8462_v3 }
 0x42a   : > { %7057 = vmatprep.mubr.msk.bf16.mxu1 %vm334_vm1, %v8475_v60 }
 0x431   : > { %7058 = vmatmul.mubr.msk.bf16.gmra.mrb[20].mxu1 %vm334_vm1, %v8478_v38 }
 0x432   : > { %7061 = vmatprep.mubr.msk.bf16.mxu1 %vm334_vm1, %v8491_v23 }
 0x439   : > { %7062 = vmatmul.mubr.msk.bf16.gmra.mrb[24].mxu1 %vm334_vm1, %v8493_v30 }
 0x43a   : > { %7065 = vmatprep.mubr.msk.bf16.mxu1 %vm334_vm1, %v8499_v63 }
 0x441   : > { %7066 = vmatmul.mubr.msk.bf16.gmra.mrb[28].mxu1 %vm334_vm1, %v8714_v26 }
 0x442   : > { %7071 = vmatprep.mubr.msk.bf16.mxu1 %vm334_vm1, %v8574_v50  ;;  %v4558_v50 = vld [vmem:[#allocation3 + $0x18a] sm:$0xff] }
 0x443   : > { %v8753_v12 = vpack.c.bf16 %v4558_v50, %v4557_v41 }
 0x449   : > { %7072 = vmatmul.mubr.msk.bf16.vlgmr.msra.gmra.mrb[0].mxu1 %vm334_vm1, %v8578_v56 }
 0x44a   : > { %7104 = vmatpush3.bf16.msra.mxu1 %v4921_v46  ;;  %7075 = vmatprep.mubr.msk.bf16.mxu1 %vm334_vm1, %v8588_v43  ;;  %v5748_v46 = vld [vmem:[#allocation2 + $0x51] sm:$0xff] }
 0x44b   : > { %7733 = vmatprep.subr.msk.bf16.mxu1 %vm581_vm0, %v6205_v19 }
 0x451   : > { %7076 = vmatmul.mubr.msk.bf16.gmra.mrb[4].mxu1 %vm334_vm1, %v8590_v0 }
 0x452   : > { %7079 = vmatprep.mubr.msk.bf16.mxu1 %vm334_vm1, %v8596_v49 }
 0x459   : > { %7080 = vmatmul.mubr.msk.bf16.gmra.mrb[8].mxu1 %vm334_vm1, %v8598_v8 }
 0x45a   : > { %7083 = vmatprep.mubr.msk.bf16.mxu1 %vm334_vm1, %v8604_v58 }
 0x461   : > { %7084 = vmatmul.mubr.msk.bf16.gmra.mrb[12].mxu1 %vm334_vm1, %v8606_v5 }
 0x462   : > { %7087 = vmatprep.mubr.msk.bf16.mxu1 %vm334_vm1, %v8612_v37 }
 0x469   : > { %7088 = vmatmul.mubr.msk.bf16.gmra.mrb[16].mxu1 %vm334_vm1, %v8614_v44 }
 0x46a   : > { %7091 = vmatprep.mubr.msk.bf16.mxu1 %vm334_vm1, %v8620_v32 }
 0x471   : > { %7092 = vmatmul.mubr.msk.bf16.gmra.mrb[20].mxu1 %vm334_vm1, %v8622_v33 }
 0x472   : > { %7095 = vmatprep.mubr.msk.bf16.mxu1 %vm334_vm1, %v8628_v40 }
 0x479   : > { %7096 = vmatmul.mubr.msk.bf16.gmra.mrb[24].mxu1 %vm334_vm1, %v8630_v1 }
 0x47a   : > { %7099 = vmatprep.mubr.msk.bf16.mxu1 %vm334_vm1, %v8636_v48 }
 0x481   : > { %7100 = vmatmul.mubr.msk.bf16.gmra.mrb[28].mxu1 %vm334_vm1, %v8753_v12 }
 0x482   : > { %7105 = vmatprep.mubr.msk.bf16.mxu1 %vm334_vm1, %v8508_v39  ;;  %v4852_v39 = vld [vmem:[#allocation3 + $0x198] sm:$0xff] }
 0x489   : > { %7106 = vmatmul.mubr.msk.bf16.vlgmr.msra.gmra.mrb[0].mxu1 %vm334_vm1, %v8521_v57  ;;  %v4853_v57 = vld [vmem:[#allocation3 + $0x1a0] sm:$0xff] }
 0x48a   : > { %7138 = vmatpush3.bf16.msra.mxu1 %v5215_v22  ;;  %7109 = vmatprep.mubr.msk.bf16.mxu1 %vm334_vm1, %v8523_v62  ;;  %v4869_v62 = vpack.c.bf16 %v4853_v57, %v4852_v39 }
 0x48b   : > { %7734 = vmatprep.subr.msk.bf16.mxu1 %vm581_vm0, %v6222_v61 }
 0x491   : > { %7110 = vmatmul.mubr.msk.bf16.gmra.mrb[4].mxu1 %vm334_vm1, %v8529_v36  ;;  %v5117_v36 = vld [vmem:[#allocation3 + $0x39] sm:$0xff] }
 0x492   : > { %7113 = vmatprep.mubr.msk.bf16.mxu1 %vm334_vm1, %v8531_v59  ;;  %v5116_v59 = vld [vmem:[#allocation3 + $0x31] sm:$0xff] }
 0x499   : > { %7114 = vmatmul.mubr.msk.bf16.gmra.mrb[8].mxu1 %vm334_vm1, %v8537_v24  ;;  %v5148_v24 = vpack.c.bf16 %v5117_v36, %v5116_v59  ;;  %v5753_v36 = vld [vmem:[#allocation2 + $0x91] sm:$0xff] }
 0x49a   : > { %7117 = vmatprep.mubr.msk.bf16.mxu1 %vm334_vm1, %v8539_v16  ;;  %v5119_v16 = vld [vmem:[#allocation3 + $0x51] sm:$0xff] }
 0x4a1   : > { %7118 = vmatmul.mubr.msk.bf16.gmra.mrb[12].mxu1 %vm334_vm1, %v8545_v9  ;;  %v5121_v9 = vld [vmem:[#allocation3 + $0x69] sm:$0xff] }
 0x4a2   : > { %7121 = vmatprep.mubr.msk.bf16.mxu1 %vm334_vm1, %v8547_v42  ;;  %v5118_v42 = vld [vmem:[#allocation3 + $0x49] sm:$0xff] }
 0x4a9   : > { %7122 = vmatmul.mubr.msk.bf16.gmra.mrb[16].mxu1 %vm334_vm1, %v8553_v53  ;;  %v5149_v53 = vpack.c.bf16 %v5119_v16, %v5118_v42  ;;  %v5751_v16 = vld [vmem:[#allocation2 + $0x79] sm:$0xff] }
 0x4aa   : > { %7125 = vmatprep.mubr.msk.bf16.mxu1 %vm334_vm1, %v8555_v20  ;;  %v5509_v20 = vsel %vm581_vm0, %v6222_v61, 0 }
 0x4b1   : > { %7126 = vmatmul.mubr.msk.bf16.gmra.mrb[20].mxu1 %vm334_vm1, %v8561_v14  ;;  %v5120_v14 = vld [vmem:[#allocation3 + $0x61] sm:$0xff] }
 0x4b2   : > { %7129 = vmatprep.mubr.msk.bf16.mxu1 %vm334_vm1, %v8563_v29  ;;  %v5150_v29 = vpack.c.bf16 %v5121_v9, %v5120_v14 }
 0x4b9   : > { %7130 = vmatmul.mubr.msk.bf16.gmra.mrb[24].mxu1 %vm334_vm1, %v8569_v11  ;;  %v5123_v11 = vld [vmem:[#allocation3 + $0x81] sm:$0xff] }
 0x4ba   : > { %7133 = vmatprep.mubr.msk.bf16.mxu1 %vm334_vm1, %v8675_v47  ;;  %v5151_v15 = vpack.c.bf16 %v5123_v11, %v5122_v55  ;;  %v5752_v11 = vld [vmem:[#allocation2 + $0x81] sm:$0xff] }
 0x4c1   : > { %7134 = vmatmul.mubr.msk.bf16.gmra.mrb[28].mxu1 %vm334_vm1, %v4869_v62 }
 0x4c2   : > { %7139 = vmatprep.mubr.msk.bf16.mxu1 %vm334_vm1, %v5148_v24 }
 0x4c9   : > { %7140 = vmatmul.mubr.msk.bf16.vlgmr.msra.gmra.mrb[0].mxu1 %vm334_vm1, %v5149_v53  ;;  %v5754_v53 = vld [vmem:[#allocation2 + $0x99] sm:$0xff] }
 0x4ca   : > { %7172 = vmatpush3.bf16.msra.mxu1 %v5509_v20  ;;  %7143 = vmatprep.mubr.msk.bf16.mxu1 %vm334_vm1, %v5150_v29 }
 0x4d1   : > { %7144 = vmatmul.mubr.msk.bf16.gmra.mrb[4].mxu1 %vm334_vm1, %v5151_v15 }
 0x4d2   : > { %7147 = vmatprep.mubr.msk.bf16.mxu1 %vm334_vm1, %v5152_v31 }
 0x4d9   : > { %7148 = vmatmul.mubr.msk.bf16.gmra.mrb[8].mxu1 %vm334_vm1, %v8443_v6  ;;  %v5146_v6 = vld [vmem:[#allocation3 + $0x199] sm:$0xff] }
 0x4da   : > { %7151 = vmatprep.mubr.msk.bf16.mxu1 %vm334_vm1, %v8446_v54  ;;  %v5147_v54 = vld [vmem:[#allocation3 + $0x1a1] sm:$0xff] }
 0x4e1   : > { %7152 = vmatmul.mubr.msk.bf16.gmra.mrb[12].mxu1 %vm334_vm1, %v8459_v13  ;;  %v5163_v13 = vpack.c.bf16 %v5147_v54, %v5146_v6 }
 0x4e2   : > { %7155 = vmatprep.mubr.msk.bf16.mxu1 %vm334_vm1, %v8462_v3  ;;  %v5440_v3 = vld [vmem:[#allocation3 + $0x19a] sm:$0xff] }
 0x4e9   : > { %7156 = vmatmul.mubr.msk.bf16.gmra.mrb[16].mxu1 %vm334_vm1, %v8475_v60  ;;  %v5441_v60 = vld [vmem:[#allocation3 + $0x1a2] sm:$0xff] }
 0x4ea   : > { %7159 = vmatprep.mubr.msk.bf16.mxu1 %vm334_vm1, %v8478_v38  ;;  %v5457_v38 = vpack.c.bf16 %v5441_v60, %v5440_v3  ;;  %v5757_v60 = vld [vmem:[#allocation2 + $0xc1] sm:$0xff] }
 0x4f1   : > { %7160 = vmatmul.mubr.msk.bf16.gmra.mrb[20].mxu1 %vm334_vm1, %v8491_v23  ;;  %v8854_v23 = vld [vmem:[%s8965_s4] ss:$0 sm:$0xff] }
 0x4f2   : > { %7163 = vmatprep.mubr.msk.bf16.mxu1 %vm334_vm1, %v8493_v30 }
 0x4f9   : > { %7164 = vmatmul.mubr.msk.bf16.gmra.mrb[24].mxu1 %vm334_vm1, %v8499_v63  ;;  %v5745_v63 = vld [vmem:[#allocation2 + $0x31] sm:$0xff] }
 0x4fa   : > { %7167 = vmatprep.mubr.msk.bf16.mxu1 %vm334_vm1, %v8714_v26 }
 0x501   : > { %7168 = vmatmul.mubr.msk.bf16.gmra.mrb[28].mxu1 %vm334_vm1, %v5163_v13 }
 0x502   : > { %7173 = vmatprep.mubr.msk.bf16.mxu1 %vm334_vm1, %v8578_v56 }
 0x509   : > { %7174 = vmatmul.mubr.msk.bf16.vlgmr.msra.gmra.mrb[0].mxu1 %vm334_vm1, %v8588_v43 }
 0x50a   : > { %7177 = vmatprep.mubr.msk.bf16.mxu1 %vm334_vm1, %v8590_v0  ;;  %v5743_v0 = vld [vmem:[#allocation2 + $0x19] sm:$0xff] }
 0x511   : > { %7178 = vmatmul.mubr.msk.bf16.gmra.mrb[4].mxu1 %vm334_vm1, %v8596_v49 }
 0x512   : > { %7181 = vmatprep.mubr.msk.bf16.mxu1 %vm334_vm1, %v8598_v8 }
 0x519   : > { %7182 = vmatmul.mubr.msk.bf16.gmra.mrb[8].mxu1 %vm334_vm1, %v8604_v58  ;;  %v5746_v58 = vld [vmem:[#allocation2 + $0x39] sm:$0xff] }
 0x51a   : > { %7185 = vmatprep.mubr.msk.bf16.mxu1 %vm334_vm1, %v8606_v5 }
 0x521   : > { %7186 = vmatmul.mubr.msk.bf16.gmra.mrb[12].mxu1 %vm334_vm1, %v8612_v37 }
 0x522   : > { %7189 = vmatprep.mubr.msk.bf16.mxu1 %vm334_vm1, %v8614_v44 }
 0x529   : > { %7190 = vmatmul.mubr.msk.bf16.gmra.mrb[16].mxu1 %vm334_vm1, %v8620_v32  ;;  %v5744_v32 = vld [vmem:[#allocation2 + $0x21] sm:$0xff] }
 0x52a   : > { %7193 = vmatprep.mubr.msk.bf16.mxu1 %vm334_vm1, %v8622_v33 }
 0x531   : > { %7194 = vmatmul.mubr.msk.bf16.gmra.mrb[20].mxu1 %vm334_vm1, %v8628_v40 }
 0x532   : > { %7197 = vmatprep.mubr.msk.bf16.mxu1 %vm334_vm1, %v8630_v1 }
 0x539   : > { %7198 = vmatmul.mubr.msk.bf16.gmra.mrb[24].mxu1 %vm334_vm1, %v8636_v48 }
 0x53a   : > { %7201 = vmatprep.mubr.msk.bf16.mxu1 %vm334_vm1, %v8753_v12 }
 0x541   : > { %7202 = vmatmul.mubr.msk.bf16.gmra.mrb[28].mxu1 %vm334_vm1, %v5457_v38 }
 0x5dc   : > { %v7175_v30 = vpop.f32.mrb[0].mxu1 }
 0x5dd   : > { %v5713_v56 = vadd.f32 %v7175_v30, %v8854_v23  ;;  %v5545_v43 = vpop.f32.mrb[1].mxu1 }
 0x5de   : > { %v5711_v49 = vadd.f32 %v8854_v23, %v5545_v43  ;;  %v7176_v8 = vpop.f32.mrb[2].mxu1 }
 0x5df   : > { %v5777_v5 = vadd.f32 %v5745_v63, %v5713_v56  ;;  %v5714_v37 = vadd.f32 %v7176_v8, %v8854_v23  ;;  %v5548_v44 = vpop.f32.mrb[3].mxu1  ;;  %v5755_v63 = vld [vmem:[#allocation2 + $0xa9] sm:$0xff] }
 0x5e0   : > { %v5775_v33 = vadd.f32 %v5743_v0, %v5711_v49  ;;  %v5712_v2 = vadd.f32 %v8854_v23, %v5548_v44  ;;  %v5758_v0 = vld [vmem:[#allocation2 + $0xc9] sm:$0xff] }
 0x5e1   : > { %v5809_v21 = vmax.f32 %v5777_v5, 0.0  ;;  %v5778_v35 = vadd.f32 %v5746_v58, %v5714_v37  ;;  %v5756_v5 = vld [vmem:[#allocation2 + $0xb1] sm:$0xff] }
 0x5e2   : > { %v5807_v40 = vmax.f32 %v5775_v33, 0.0  ;;  %v5776_v1 = vadd.f32 %v5744_v32, %v5712_v2 }
 0x5e3   : > { %5841 = vst.msk [vmem:[%s8863_s21 + $0x10] sm:$0xff] %vm334_vm1, %v5809_v21  ;;  %v5810_v7 = vmax.f32 %v5778_v35, 0.0 }
 0x5e4   : > { %5839 = vst.msk [vmem:[%s8863_s21] sm:$0xff] %vm334_vm1, %v5807_v40  ;;  %v5808_v34 = vmax.f32 %v5776_v1, 0.0  ;;  %v7179_v48 = vpop.f32.mrb[4].mxu1 }
 0x5e5   : > { %5842 = vst.msk [vmem:[%s8863_s21 + $0x18] sm:$0xff] %vm334_vm1, %v5810_v7  ;;  %v5717_v51 = vadd.f32 %v7179_v48, %v8854_v23  ;;  %v5561_v25 = vpop.f32.mrb[5].mxu1  ;;  %v5761_v7 = vld [vmem:[#allocation2 + $0xf1] sm:$0xff] }
 0x5e6   : > { %5840 = vst.msk [vmem:[%s8863_s21 + $0x8] sm:$0xff] %vm334_vm1, %v5808_v34  ;;  %v5715_v47 = vadd.f32 %v8854_v23, %v5561_v25  ;;  %v7180_v52 = vpop.f32.mrb[6].mxu1 }
 0x5e7   : > { %v5781_v4 = vadd.f32 %v5749_v18, %v5717_v51  ;;  %v5718_v28 = vadd.f32 %v7180_v52, %v8854_v23  ;;  %v5564_v26 = vpop.f32.mrb[7].mxu1  ;;  %v5759_v18 = vld [vmem:[#allocation2 + $0xd9] sm:$0xff] }
 0x5e8   : > { %v5779_v19 = vadd.f32 %v5747_v27, %v5715_v47  ;;  %v5716_v41 = vadd.f32 %v8854_v23, %v5564_v26  ;;  %v5762_v27 = vld [vmem:[#allocation2 + $0xf9] sm:$0xff] }
 0x5e9   : > { %v5813_v50 = vmax.f32 %v5781_v4, 0.0  ;;  %v5782_v12 = vadd.f32 %v5750_v10, %v5718_v28  ;;  %v5760_v4 = vld [vmem:[#allocation2 + $0xe1] sm:$0xff] }
 0x5ea   : > { %v5811_v22 = vmax.f32 %v5779_v19, 0.0  ;;  %v5780_v61 = vadd.f32 %v5748_v46, %v5716_v41 }
 0x5eb   : > { %5845 = vst.msk [vmem:[%s8863_s21 + $0x30] sm:$0xff] %vm334_vm1, %v5813_v50  ;;  %v5814_v39 = vmax.f32 %v5782_v12, 0.0 }
 0x5ec   : > { %5843 = vst.msk [vmem:[%s8863_s21 + $0x20] sm:$0xff] %vm334_vm1, %v5811_v22  ;;  %v5812_v57 = vmax.f32 %v5780_v61, 0.0  ;;  %v7183_v62 = vpop.f32.mrb[8].mxu1 }
 0x5ed   : > { %5846 = vst.msk [vmem:[%s8863_s21 + $0x38] sm:$0xff] %vm334_vm1, %v5814_v39  ;;  %v5721_v59 = vadd.f32 %v7183_v62, %v8854_v23  ;;  %v5577_v24 = vpop.f32.mrb[9].mxu1  ;;  %v5765_v39 = vld [vmem:[#allocation2 + $0x121] sm:$0xff] }
 0x5ee   : > { %5844 = vst.msk [vmem:[%s8863_s21 + $0x28] sm:$0xff] %vm334_vm1, %v5812_v57  ;;  %v5719_v9 = vadd.f32 %v8854_v23, %v5577_v24  ;;  %v7184_v42 = vpop.f32.mrb[10].mxu1 }
 0x5ef   : > { %v5785_v20 = vadd.f32 %v5753_v36, %v5721_v59  ;;  %v5722_v14 = vadd.f32 %v7184_v42, %v8854_v23  ;;  %v5580_v29 = vpop.f32.mrb[11].mxu1  ;;  %v5763_v36 = vld [vmem:[#allocation2 + $0x109] sm:$0xff] }
 0x5f0   : > { %v5783_v45 = vadd.f32 %v5751_v16, %v5719_v9  ;;  %v5720_v55 = vadd.f32 %v8854_v23, %v5580_v29  ;;  %v5766_v16 = vld [vmem:[#allocation2 + $0x129] sm:$0xff] }
 0x5f1   : > { %v5817_v15 = vmax.f32 %v5785_v20, 0.0  ;;  %v5786_v17 = vadd.f32 %v5754_v53, %v5722_v14  ;;  %v5764_v20 = vld [vmem:[#allocation2 + $0x111] sm:$0xff] }
 0x5f2   : > { %v5815_v31 = vmax.f32 %v5783_v45, 0.0  ;;  %v5784_v6 = vadd.f32 %v5752_v11, %v5720_v55 }
 0x5f3   : > { %5849 = vst.msk [vmem:[%s8863_s21 + $0x50] sm:$0xff] %vm334_vm1, %v5817_v15  ;;  %v5818_v54 = vmax.f32 %v5786_v17, 0.0 }
 0x5f4   : > { %5847 = vst.msk [vmem:[%s8863_s21 + $0x40] sm:$0xff] %vm334_vm1, %v5815_v31  ;;  %v5816_v13 = vmax.f32 %v5784_v6, 0.0  ;;  %v7187_v3 = vpop.f32.mrb[12].mxu1 }
 0x5f5   : > { %5850 = vst.msk [vmem:[%s8863_s21 + $0x58] sm:$0xff] %vm334_vm1, %v5818_v54  ;;  %v5725_v38 = vadd.f32 %v7187_v3, %v8854_v23  ;;  %v5593_v30 = vpop.f32.mrb[13].mxu1  ;;  %v5769_v54 = vld [vmem:[#allocation2 + $0x151] sm:$0xff] }
 0x5f6   : > { %5848 = vst.msk [vmem:[%s8863_s21 + $0x48] sm:$0xff] %vm334_vm1, %v5816_v13  ;;  %v5723_v56 = vadd.f32 %v8854_v23, %v5593_v30  ;;  %v7188_v43 = vpop.f32.mrb[14].mxu1 }
 0x5f7   : > { %v5789_v49 = vadd.f32 %v5757_v60, %v5725_v38  ;;  %v5726_v8 = vadd.f32 %v7188_v43, %v8854_v23  ;;  %v5596_v58 = vpop.f32.mrb[15].mxu1  ;;  %v5767_v60 = vld [vmem:[#allocation2 + $0x139] sm:$0xff] }
 0x5f8   : > { %v5787_v37 = vadd.f32 %v5755_v63, %v5723_v56  ;;  %v5724_v44 = vadd.f32 %v8854_v23, %v5596_v58  ;;  %v5770_v63 = vld [vmem:[#allocation2 + $0x159] sm:$0xff] }
 0x5f9   : > { %v5821_v32 = vmax.f32 %v5789_v49, 0.0  ;;  %v5790_v33 = vadd.f32 %v5758_v0, %v5726_v8  ;;  %v5768_v49 = vld [vmem:[#allocation2 + $0x141] sm:$0xff] }
 0x5fa   : > { %v5819_v2 = vmax.f32 %v5787_v37, 0.0  ;;  %v5788_v21 = vadd.f32 %v5756_v5, %v5724_v44 }
 0x5fb   : > { %5853 = vst.msk [vmem:[%s8863_s21 + $0x70] sm:$0xff] %vm334_vm1, %v5821_v32  ;;  %v5822_v35 = vmax.f32 %v5790_v33, 0.0 }
 0x5fc   : > { %5851 = vst.msk [vmem:[%s8863_s21 + $0x60] sm:$0xff] %vm334_vm1, %v5819_v2  ;;  %v5820_v40 = vmax.f32 %v5788_v21, 0.0  ;;  %v7191_v1 = vpop.f32.mrb[16].mxu1 }
 0x5fd   : > { %5854 = vst.msk [vmem:[%s8863_s21 + $0x78] sm:$0xff] %vm334_vm1, %v5822_v35  ;;  %v5729_v34 = vadd.f32 %v7191_v1, %v8854_v23  ;;  %v5609_v48 = vpop.f32.mrb[17].mxu1  ;;  %v5773_v35 = vld [vmem:[#allocation2 + $0x181] sm:$0xff] }
 0x5fe   : > { %5852 = vst.msk [vmem:[%s8863_s21 + $0x68] sm:$0xff] %vm334_vm1, %v5820_v40  ;;  %v5727_v51 = vadd.f32 %v8854_v23, %v5609_v48  ;;  %v7192_v25 = vpop.f32.mrb[18].mxu1 }
 0x5ff   : > { %v5793_v47 = vadd.f32 %v5761_v7, %v5729_v34  ;;  %v5730_v52 = vadd.f32 %v7192_v25, %v8854_v23  ;;  %v5612_v10 = vpop.f32.mrb[19].mxu1  ;;  %v5771_v7 = vld [vmem:[#allocation2 + $0x169] sm:$0xff] }
 0x600   : > { %v5791_v28 = vadd.f32 %v5759_v18, %v5727_v51  ;;  %v5728_v26 = vadd.f32 %v8854_v23, %v5612_v10  ;;  %v5774_v18 = vld [vmem:[#allocation2 + $0x189] sm:$0xff] }
 0x601   : > { %v5825_v46 = vmax.f32 %v5793_v47, 0.0  ;;  %v5794_v19 = vadd.f32 %v5762_v27, %v5730_v52  ;;  %v5772_v47 = vld [vmem:[#allocation2 + $0x171] sm:$0xff] }
 0x602   : > { %v5823_v41 = vmax.f32 %v5791_v28, 0.0  ;;  %v5792_v50 = vadd.f32 %v5760_v4, %v5728_v26 }
 0x603   : > { %5857 = vst.msk [vmem:[%s8863_s21 + $0x90] sm:$0xff] %vm334_vm1, %v5825_v46  ;;  %v5826_v12 = vmax.f32 %v5794_v19, 0.0 }
 0x604   : > { %5855 = vst.msk [vmem:[%s8863_s21 + $0x80] sm:$0xff] %vm334_vm1, %v5823_v41  ;;  %v5824_v22 = vmax.f32 %v5792_v50, 0.0  ;;  %v7195_v61 = vpop.f32.mrb[20].mxu1 }
 0x605   : > { %5858 = vst.msk [vmem:[%s8863_s21 + $0x98] sm:$0xff] %vm334_vm1, %v5826_v12  ;;  %v5733_v57 = vadd.f32 %v7195_v61, %v8854_v23  ;;  %v5625_v62 = vpop.f32.mrb[21].mxu1 }
 0x606   : > { %5856 = vst.msk [vmem:[%s8863_s21 + $0x88] sm:$0xff] %vm334_vm1, %v5824_v22  ;;  %v5731_v59 = vadd.f32 %v8854_v23, %v5625_v62  ;;  %v7196_v24 = vpop.f32.mrb[22].mxu1 }
 0x607   : > { %v5797_v9 = vadd.f32 %v5765_v39, %v5733_v57  ;;  %v5734_v42 = vadd.f32 %v7196_v24, %v8854_v23  ;;  %v5628_v53 = vpop.f32.mrb[23].mxu1 }
 0x608   : > { %v5795_v14 = vadd.f32 %v5763_v36, %v5731_v59  ;;  %v5732_v29 = vadd.f32 %v8854_v23, %v5628_v53 }
 0x609   : > { %v5829_v11 = vmax.f32 %v5797_v9, 0.0  ;;  %v5798_v45 = vadd.f32 %v5766_v16, %v5734_v42 }
 0x60a   : > { %v5827_v55 = vmax.f32 %v5795_v14, 0.0  ;;  %v5796_v15 = vadd.f32 %v5764_v20, %v5732_v29 }
 0x60b   : > { %5861 = vst.msk [vmem:[%s8863_s21 + $0xb0] sm:$0xff] %vm334_vm1, %v5829_v11  ;;  %v5830_v17 = vmax.f32 %v5798_v45, 0.0 }
 0x60c   : > { %5859 = vst.msk [vmem:[%s8863_s21 + $0xa0] sm:$0xff] %vm334_vm1, %v5827_v55  ;;  %v5828_v31 = vmax.f32 %v5796_v15, 0.0  ;;  %v7199_v6 = vpop.f32.mrb[24].mxu1 }
 0x60d   : > { %5862 = vst.msk [vmem:[%s8863_s21 + $0xb8] sm:$0xff] %vm334_vm1, %v5830_v17  ;;  %v5737_v13 = vadd.f32 %v7199_v6, %v8854_v23  ;;  %v5641_v3 = vpop.f32.mrb[25].mxu1 }
 0x60e   : > { %5860 = vst.msk [vmem:[%s8863_s21 + $0xa8] sm:$0xff] %vm334_vm1, %v5828_v31  ;;  %v5735_v38 = vadd.f32 %v8854_v23, %v5641_v3  ;;  %v7200_v30 = vpop.f32.mrb[26].mxu1 }
 0x60f   : > { %v5801_v56 = vadd.f32 %v5769_v54, %v5737_v13  ;;  %v5738_v43 = vadd.f32 %v7200_v30, %v8854_v23  ;;  %v5644_v0 = vpop.f32.mrb[27].mxu1 }
 0x610   : > { %v5799_v8 = vadd.f32 %v5767_v60, %v5735_v38  ;;  %v5736_v58 = vadd.f32 %v8854_v23, %v5644_v0 }
 0x611   : > { %v5833_v5 = vmax.f32 %v5801_v56, 0.0  ;;  %v5802_v37 = vadd.f32 %v5770_v63, %v5738_v43 }
 0x612   : > { %v5831_v44 = vmax.f32 %v5799_v8, 0.0  ;;  %v5800_v32 = vadd.f32 %v5768_v49, %v5736_v58 }
 0x613   : > { %5865 = vst.msk [vmem:[%s8863_s21 + $0xd0] sm:$0xff] %vm334_vm1, %v5833_v5  ;;  %v5834_v33 = vmax.f32 %v5802_v37, 0.0 }
 0x614   : > { %5863 = vst.msk [vmem:[%s8863_s21 + $0xc0] sm:$0xff] %vm334_vm1, %v5831_v44  ;;  %v5832_v2 = vmax.f32 %v5800_v32, 0.0  ;;  %v7203_v21 = vpop.f32.mrb[28].mxu1 }
 0x615   : > { %5866 = vst.msk [vmem:[%s8863_s21 + $0xd8] sm:$0xff] %vm334_vm1, %v5834_v33  ;;  %v5741_v40 = vadd.f32 %v7203_v21, %v8854_v23  ;;  %v5657_v1 = vpop.f32.mrb[29].mxu1 }
 0x616   : > { %5864 = vst.msk [vmem:[%s8863_s21 + $0xc8] sm:$0xff] %vm334_vm1, %v5832_v2  ;;  %v5739_v34 = vadd.f32 %v8854_v23, %v5657_v1  ;;  %v7204_v48 = vpop.f32.mrb[30].mxu1 }
 0x617   : > { %v5805_v51 = vadd.f32 %v5773_v35, %v5741_v40  ;;  %v5742_v25 = vadd.f32 %v7204_v48, %v8854_v23  ;;  %v5660_v27 = vpop.f32.mrb[31].mxu1 }
 0x618   : > { %v5803_v52 = vadd.f32 %v5771_v7, %v5739_v34  ;;  %v5740_v10 = vadd.f32 %v8854_v23, %v5660_v27 }
 0x619   : > { %v5837_v4 = vmax.f32 %v5805_v51, 0.0  ;;  %v5806_v28 = vadd.f32 %v5774_v18, %v5742_v25 }
 0x61a   : > { %v5835_v26 = vmax.f32 %v5803_v52, 0.0  ;;  %v5804_v46 = vadd.f32 %v5772_v47, %v5740_v10 }
 0x61b   : > { %5869 = vst.msk [vmem:[%s8863_s21 + $0xf0] sm:$0xff] %vm334_vm1, %v5837_v4  ;;  %v5838_v19 = vmax.f32 %v5806_v28, 0.0 }
 0x61c   : > { %5867 = vst.msk [vmem:[%s8863_s21 + $0xe0] sm:$0xff] %vm334_vm1, %v5835_v26  ;;  %v5836_v41 = vmax.f32 %v5804_v46, 0.0 }
 0x61d   : > { %5870 = vst.msk [vmem:[%s8863_s21 + $0xf8] sm:$0xff] %vm334_vm1, %v5838_v19 }
 0x61e   : > { %5868 = vst.msk [vmem:[%s8863_s21 + $0xe8] sm:$0xff] %vm334_vm1, %v5836_v41 }
 0x61f PF: > { %s15_s18 = sadd.s32 1, %s7751_s18  }
 0x620   : > { %p12_p4 = scmp.ge.s32.totalorder %s15_s18, 4  }
 0x622   :  { %14 = sbr.rel (!%p12_p4) target bundleno = 1 (0x1), region = 91 }

</bundles_post_ra>
